<compile_context>
chip_gen: v6e
topology: v6e:2x2x1
jax: 0.10.0
libtpu: 0.0.40
codegen_flags: <defaults>
</compile_context>

<pallas_src>
from functools import partial

import jax
import jax.numpy as jnp
from jax.experimental import pallas as pl
from jax.experimental.pallas import tpu as pltpu

NEG_INF = -1e30


def _masked_softmax(logits, mask, axis):
    """softmax(where(mask != 0, logits, -1e30), axis).  Exact divide (tracks
    jax.nn.softmax at f32); fully masked slices give a uniform distribution."""
    x = jnp.where(mask != 0, logits, NEG_INF)
    m = jnp.max(x, axis=axis, keepdims=True)
    e = jnp.exp(x - m)
    s = jnp.sum(e, axis=axis, keepdims=True)
    return e / s


def dcn_kernel(q_ref, c_ref, qm_ref, cm_ref, wt_ref, b_ref, o_ref, *,
               transpose_aq):
    bb, q_len, d = q_ref.shape
    c_len = c_ref.shape[1]
    bf16 = jnp.bfloat16
    f32 = jnp.float32

    q_bf = q_ref[...]          # (bb, q_len, d)  bf16 (pre-cast in wrapper)
    c_bf = c_ref[...]          # (bb, c_len, d)  bf16
    qm = qm_ref[...]           # (bb, 1, q_len) or (bb, q_len, 1)  f32
    cm = cm_ref[...]           # (bb, 1, c_len)  f32
    wt = wt_ref[...]           # (d, d)          bf16, pre-transposed (in, out)
    bias = b_ref[...]          # (1, d)          f32

    # ---- Shared Linear + tanh: one (bb*q_len, d) x (d, d) MXU pass, f32 acc.
    lin = jnp.dot(q_bf.reshape(bb * q_len, d), wt,
                  preferred_element_type=f32) + bias
    q_tanh_bf = jnp.tanh(lin).astype(bf16).reshape(bb, q_len, d)

    # ---- Affinity matrix L = q_tanh @ c^T  (feature-axis contraction only).
    L = jnp.einsum('bqd,bcd->bqc', q_tanh_bf, c_bf,
                   preferred_element_type=f32)           # (bb, q_len, c_len)

    if transpose_aq:
        # MXU-bound regime (d >= 128): reuse L, transpose Aq on the XLU
        # instead of paying a second affinity matmul.  qm is (bb, q_len, 1).
        Aq = _masked_softmax(L, qm, axis=2)              # (bb, q_len, c_len)
        AqT_bf = jnp.swapaxes(Aq.astype(bf16), 1, 2)     # (bb, c_len, q_len)
    else:
        # Small-d regime: second feature-axis contraction gives Aq^T directly
        # (no transpose of any operand is ever materialized). qm is (bb,1,q).
        LT = jnp.einsum('bcd,bqd->bcq', c_bf, q_tanh_bf,
                        preferred_element_type=f32)      # (bb, c_len, q_len)
        AqT_bf = _masked_softmax(LT, qm, axis=1).astype(bf16)

    # Ac = masked_softmax(L, c_mask, dim=1)
    Ac_bf = _masked_softmax(L, cm, axis=1).astype(bf16)

    # ---- Q2C = Ac @ c : (bb, q_len, d)
    Q2C_bf = jnp.einsum('bqc,bcd->bqd', Ac_bf, c_bf,
                        preferred_element_type=f32).astype(bf16)

    # ---- Output: [Aq^T @ Q2C | Aq^T @ q]  == concat(Q2C_attended, C2Q)
    if d % 128 == 0:
        # Lane-aligned static slices -> two unmasked full-lane stores, no
        # concatenate materialization, no zero-pad FLOPs.
        o_ref[:, :, 0:d] = jnp.einsum(
            'bcq,bqd->bcd', AqT_bf, Q2C_bf,
            preferred_element_type=f32).astype(o_ref.dtype)
        o_ref[:, :, d:2 * d] = jnp.einsum(
            'bcq,bqd->bcd', AqT_bf, q_bf,
            preferred_element_type=f32).astype(o_ref.dtype)
    else:
        # Small d: fuse into a single matmul with a (bb, q_len, 2d) rhs and
        # one full-tile store (cheaper than two sub-lane masked stores).
        rhs = jnp.concatenate([Q2C_bf, q_bf], axis=-1)   # (bb, q_len, 2d)
        o_ref[...] = jnp.einsum('bcq,bqe->bce', AqT_bf, rhs,
                                preferred_element_type=f32).astype(o_ref.dtype)


def _estimate_block_vmem(bb, q_len, c_len, d, out_dim, out_bytes=4):
    """Rough VMEM bytes for one batch block (double-buffered I/O + temps)."""
    io = 2 * bb * (q_len * d * 2 + c_len * d * 2        # bf16 q, c
                   + q_len * 4 + c_len * 4              # f32 masks
                   + c_len * out_dim * out_bytes)       # output block
    io += 2 * (d * d * 2 + d * 4)                       # weight + bias
    inter = bb * (3 * q_len * c_len * 4                 # L, LT/Aq, Ac
                  + q_len * d * 6                       # q_tanh, Q2C
                  + q_len * out_dim * 2                 # fused rhs
                  + c_len * out_dim * 4)                # result before store
    return io + inter


def _choose_block_b(B, q_len, c_len, d, out_dim, *, target_m=256,
                    vmem_budget=24 * 1024 * 1024):
    """Pick block_b: fill the MXU M dimension (block_b*q_len >= target_m),
    keep an even grid for v7x's two TensorCores when possible, stay inside a
    conservative VMEM budget.  Small batches fall back to one fat step."""
    divisors = [x for x in range(1, B + 1) if B % x == 0]
    fits = [bb for bb in divisors
            if _estimate_block_vmem(bb, q_len, c_len, d, out_dim) <= vmem_budget]
    if not fits:
        fits = [1]
    for want_even in (True, False):
        for bb in fits:                      # ascending: smallest that hits M
            gb = B // bb
            if bb * q_len >= target_m and gb >= 2 and (not want_even or gb % 2 == 0):
                return bb
    # Batch too small to reach the MXU-M target: take the biggest block that
    # fits (per-step overhead amortization dominates at these shapes).
    return fits[-1]


def dcn_forward(c, q, c_mask, q_mask, w, b, block_b=None,
                out_dtype=jnp.float32, vmem_limit_bytes=48 * 1024 * 1024):
    B, c_len, d = c.shape
    q_len = q.shape[1]
    out_dim = 2 * d
    transpose_aq = (d >= 128)

    if block_b is None:
        block_b = _choose_block_b(B, q_len, c_len, d, out_dim)
    assert B % block_b == 0
    grid_b = B // block_b

    # One-time dtype/layout prep in the wrapper (not per grid step):
    q_bf = q.astype(jnp.bfloat16)
    c_bf = c.astype(jnp.bfloat16)
    w_t = jnp.transpose(w).astype(jnp.bfloat16)          # (in, out) bf16
    b2 = jnp.reshape(b, (1, d)).astype(jnp.float32)
    cm = jnp.reshape(c_mask, (B, 1, c_len)).astype(jnp.float32)
    if transpose_aq:
        qm = jnp.reshape(q_mask, (B, q_len, 1)).astype(jnp.float32)
        qm_spec = pl.BlockSpec((block_b, q_len, 1), lambda i: (i, 0, 0))
    else:
        qm = jnp.reshape(q_mask, (B, 1, q_len)).astype(jnp.float32)
        qm_spec = pl.BlockSpec((block_b, 1, q_len), lambda i: (i, 0, 0))

    # TODO(synk): per-generation tuning — raise vmem_limit / block_b on
    # v5e/v6e (128 MiB VMEM), keep <=~48 MiB and an even grid on v7x (64 MiB,
    # 2 TensorCores).
    out = pl.pallas_call(
        partial(dcn_kernel, transpose_aq=transpose_aq),
        out_shape=jax.ShapeDtypeStruct((B, c_len, out_dim), out_dtype),
        grid_spec=pltpu.PrefetchScalarGridSpec(
            num_scalar_prefetch=0,
            grid=(grid_b,),
            in_specs=[
                pl.BlockSpec((block_b, q_len, d), lambda i: (i, 0, 0)),
                pl.BlockSpec((block_b, c_len, d), lambda i: (i, 0, 0)),
                qm_spec,
                pl.BlockSpec((block_b, 1, c_len), lambda i: (i, 0, 0)),
                pl.BlockSpec((d, d), lambda i: (0, 0)),
                pl.BlockSpec((1, d), lambda i: (0, 0)),
            ],
            out_specs=pl.BlockSpec((block_b, c_len, out_dim),
                                   lambda i: (i, 0, 0)),
        ),
        compiler_params=pltpu.CompilerParams(
            dimension_semantics=("parallel",),
            vmem_limit_bytes=vmem_limit_bytes,
        ),
    )(q_bf, c_bf, qm, cm, w_t, b2)
    return out


def dcn_reference(c, q, c_mask, q_mask, w, b, mxu_dtype=jnp.float32):
    """Pure-JAX reference mirroring the PyTorch forward.  `mxu_dtype=bfloat16`
    emulates the kernel's bf16-input / f32-accumulate matmuls."""
    f32 = jnp.float32
    cast = lambda x: x.astype(mxu_dtype)
    lin = jnp.einsum('bqd,ed->bqe', cast(q), cast(w),
                     preferred_element_type=f32) + b
    q_tanh = jnp.tanh(lin)
    L = jnp.einsum('bqd,bcd->bqc', cast(q_tanh), cast(c),
                   preferred_element_type=f32)
    Aq = jax.nn.softmax(jnp.where(q_mask != 0, L, NEG_INF), axis=2)
    Ac = jax.nn.softmax(jnp.where(c_mask != 0, L, NEG_INF), axis=1)
    C2Q = jnp.einsum('bqc,bqd->bcd', cast(Aq), cast(q),
                     preferred_element_type=f32)
    Q2C = jnp.einsum('bqc,bcd->bqd', cast(Ac), cast(c),
                     preferred_element_type=f32)
    Q2C_att = jnp.einsum('bqc,bqd->bcd', cast(Aq), cast(Q2C),
                         preferred_element_type=f32)
    return jnp.concatenate([Q2C_att, C2Q], axis=2)


if __name__ == "__main__":
    key = jax.random.PRNGKey(0)
    hidden_size = 16
    d = 2 * hidden_size          # feature dim of c and q
    B, c_len, q_len = 8, 16, 8

    k1, k2, k3, k4 = jax.random.split(key, 4)
    c = jax.random.normal(k1, (B, c_len, d), dtype=jnp.float32)
    q = jax.random.normal(k2, (B, q_len, d), dtype=jnp.float32)

    # Deterministic parameter init (xavier-uniform weight, uniform bias).
    limit = (6.0 / (d + d)) ** 0.5
    w = jax.random.uniform(k3, (d, d), minval=-limit, maxval=limit,
                           dtype=jnp.float32)
    b = jax.random.uniform(k4, (1, d), minval=-1.0 / (d ** 0.5),
                           maxval=1.0 / (d ** 0.5), dtype=jnp.float32)

    # Masks: 1 = valid token, 0 = padding (per-batch valid lengths).
    c_valid = jnp.array([c_len, c_len - 3, c_len - 5, c_len,
                         c_len - 1, c_len - 7, c_len, c_len - 2])
    q_valid = jnp.array([q_len, q_len - 2, q_len, q_len - 3,
                         q_len - 1, q_len, q_len - 4, q_len])
    c_mask = (jnp.arange(c_len)[None, :] < c_valid[:, None]
              ).astype(jnp.float32).reshape(B, 1, c_len)
    q_mask = (jnp.arange(q_len)[None, :] < q_valid[:, None]
              ).astype(jnp.float32).reshape(B, q_len, 1)

    out = dcn_forward(c, q, c_mask, q_mask, w, b)
    out = jax.block_until_ready(out)
    assert out.shape == (B, c_len, 2 * d), out.shape

    # Check against a precision-matched (bf16-MXU-input) reference.
    ref_bf16 = dcn_reference(c, q, c_mask, q_mask, w, b,
                             mxu_dtype=jnp.bfloat16)
    err_bf = float(jnp.max(jnp.abs(out - ref_bf16)))
    assert err_bf < 5e-2, err_bf

    # Sanity check against the full-f32 reference (bf16 MXU inputs only).
    ref_f32 = dcn_reference(c, q, c_mask, q_mask, w, b,
                            mxu_dtype=jnp.float32)
    rel = float(jnp.linalg.norm(out - ref_f32) / jnp.linalg.norm(ref_f32))
    assert rel < 5e-2, rel

    print("KERNEL_OK")
</pallas_src>

<mosaic_0001>
module attributes {stable_mosaic.version = 11 : i64} {
  func.func @dcn_kernel(%arg0: i32, %arg1: memref<8x8x32xbf16, #tpu.memory_space<vmem>>, %arg2: memref<8x16x32xbf16, #tpu.memory_space<vmem>>, %arg3: memref<8x1x8xf32, #tpu.memory_space<vmem>>, %arg4: memref<8x1x16xf32, #tpu.memory_space<vmem>>, %arg5: memref<32x32xbf16, #tpu.memory_space<vmem>>, %arg6: memref<1x32xf32, #tpu.memory_space<vmem>>, %arg7: memref<8x16x64xf32, #tpu.memory_space<vmem>>) attributes {dimension_semantics = [#tpu.dimension_semantics<parallel>], iteration_bounds = array<i64: 1>, scalar_prefetch = 0 : i64, scratch_operands = 0 : i64, tpu.core_type = #tpu.core_type<tc>, window_params = [{transform_indices = @transform_0, window_bounds = array<i64: 8, 8, 32>}, {transform_indices = @transform_1, window_bounds = array<i64: 8, 16, 32>}, {transform_indices = @transform_2, window_bounds = array<i64: 8, 1, 8>}, {transform_indices = @transform_3, window_bounds = array<i64: 8, 1, 16>}, {pipeline_mode = #tpu.pipeline_mode<synchronous>, transform_indices = @transform_4, window_bounds = array<i64: 32, 32>}, {pipeline_mode = #tpu.pipeline_mode<synchronous>, transform_indices = @transform_5, window_bounds = array<i64: 1, 32>}, {transform_indices = @transform_6, window_bounds = array<i64: 8, 16, 64>}]} {
    %c0 = arith.constant 0 : index
    %c0_0 = arith.constant 0 : index
    %c0_1 = arith.constant 0 : index
    %0 = vector.load %arg1[%c0, %c0_0, %c0_1] : memref<8x8x32xbf16, #tpu.memory_space<vmem>>, vector<8x8x32xbf16>
    %c0_2 = arith.constant 0 : index
    %c0_3 = arith.constant 0 : index
    %c0_4 = arith.constant 0 : index
    %1 = vector.load %arg2[%c0_2, %c0_3, %c0_4] : memref<8x16x32xbf16, #tpu.memory_space<vmem>>, vector<8x16x32xbf16>
    %c0_5 = arith.constant 0 : index
    %c0_6 = arith.constant 0 : index
    %c0_7 = arith.constant 0 : index
    %2 = vector.load %arg3[%c0_5, %c0_6, %c0_7] : memref<8x1x8xf32, #tpu.memory_space<vmem>>, vector<8x1x8xf32>
    %c0_8 = arith.constant 0 : index
    %c0_9 = arith.constant 0 : index
    %c0_10 = arith.constant 0 : index
    %3 = vector.load %arg4[%c0_8, %c0_9, %c0_10] : memref<8x1x16xf32, #tpu.memory_space<vmem>>, vector<8x1x16xf32>
    %c0_11 = arith.constant 0 : index
    %c0_12 = arith.constant 0 : index
    %4 = vector.load %arg5[%c0_11, %c0_12] : memref<32x32xbf16, #tpu.memory_space<vmem>>, vector<32x32xbf16>
    %c0_13 = arith.constant 0 : index
    %c0_14 = arith.constant 0 : index
    %5 = vector.load %arg6[%c0_13, %c0_14] : memref<1x32xf32, #tpu.memory_space<vmem>>, vector<1x32xf32>
    %6 = vector.shape_cast %0 : vector<8x8x32xbf16> to vector<64x32xbf16>
    %cst = arith.constant dense<0.000000e+00> : vector<64x32xf32>
    %7 = tpu.matmul %6, %4, %cst {dimension_numbers = #tpu.dot_dimension_numbers<[1], [0], [0], [1], [0, 0, 1, 1], [], []>} : vector<64x32xbf16>, vector<32x32xbf16>, vector<64x32xf32> -> vector<64x32xf32>
    %8 = vector.broadcast %5 : vector<1x32xf32> to vector<64x32xf32>
    %9 = arith.addf %7, %8 : vector<64x32xf32>
    %10 = math.tanh %9 : vector<64x32xf32>
    %11 = arith.truncf %10 : vector<64x32xf32> to vector<64x32xbf16>
    %12 = vector.shape_cast %11 : vector<64x32xbf16> to vector<8x8x32xbf16>
    "tpu.trace_start"() <{level = 10 : i32, message = "bqd,bcd->bqc"}> : () -> ()
    %cst_15 = arith.constant dense<0.000000e+00> : vector<8x8x16xf32>
    %13 = tpu.matmul %12, %1, %cst_15 {dimension_numbers = #tpu.dot_dimension_numbers<[2], [2], [1], [1], [0, 0, 0, 1, 1, 1], [0], [0]>} : vector<8x8x32xbf16>, vector<8x16x32xbf16>, vector<8x8x16xf32> -> vector<8x8x16xf32>
    "tpu.trace_stop"() : () -> ()
    "tpu.trace_start"() <{level = 10 : i32, message = "bcd,bqd->bcq"}> : () -> ()
    %cst_16 = arith.constant dense<0.000000e+00> : vector<8x16x8xf32>
    %14 = tpu.matmul %1, %12, %cst_16 {dimension_numbers = #tpu.dot_dimension_numbers<[2], [2], [1], [1], [0, 0, 0, 1, 1, 1], [0], [0]>} : vector<8x16x32xbf16>, vector<8x8x32xbf16>, vector<8x16x8xf32> -> vector<8x16x8xf32>
    %cst_17 = arith.constant 0.000000e+00 : f32
    "tpu.trace_stop"() : () -> ()
    %15 = vector.broadcast %cst_17 : f32 to vector<8x1x8xf32>
    %16 = arith.cmpf one, %2, %15 : vector<8x1x8xf32>
    %cst_18 = arith.constant -1.000000e+30 : f32
    %17 = vector.shape_cast %16 : vector<8x1x8xi1> to vector<8x1x8xi1>
    %18 = vector.broadcast %17 : vector<8x1x8xi1> to vector<8x16x8xi1>
    %19 = vector.broadcast %cst_18 : f32 to vector<8x16x8xf32>
    %20 = arith.select %18, %14, %19 : vector<8x16x8xi1>, vector<8x16x8xf32>
    %cst_19 = arith.constant dense<0xFF800000> : vector<8x8xf32>
    %21 = vector.multi_reduction <maximumf>, %20, %cst_19 [1] : vector<8x16x8xf32> to vector<8x8xf32>
    %22 = vector.shape_cast %21 : vector<8x8xf32> to vector<8x1x8xf32>
    %23 = vector.broadcast %22 : vector<8x1x8xf32> to vector<8x16x8xf32>
    %24 = arith.subf %20, %23 : vector<8x16x8xf32>
    %25 = math.exp %24 : vector<8x16x8xf32>
    %cst_20 = arith.constant dense<0.000000e+00> : vector<8x8xf32>
    %26 = vector.multi_reduction <add>, %25, %cst_20 [1] : vector<8x16x8xf32> to vector<8x8xf32>
    %27 = vector.shape_cast %26 : vector<8x8xf32> to vector<8x1x8xf32>
    %28 = vector.broadcast %27 : vector<8x1x8xf32> to vector<8x16x8xf32>
    %29 = arith.divf %25, %28 : vector<8x16x8xf32>
    %30 = arith.truncf %29 : vector<8x16x8xf32> to vector<8x16x8xbf16>
    %cst_21 = arith.constant 0.000000e+00 : f32
    %31 = vector.broadcast %cst_21 : f32 to vector<8x1x16xf32>
    %32 = arith.cmpf one, %3, %31 : vector<8x1x16xf32>
    %cst_22 = arith.constant -1.000000e+30 : f32
    %33 = vector.shape_cast %32 : vector<8x1x16xi1> to vector<8x1x16xi1>
    %34 = vector.broadcast %33 : vector<8x1x16xi1> to vector<8x8x16xi1>
    %35 = vector.broadcast %cst_22 : f32 to vector<8x8x16xf32>
    %36 = arith.select %34, %13, %35 : vector<8x8x16xi1>, vector<8x8x16xf32>
    %cst_23 = arith.constant dense<0xFF800000> : vector<8x16xf32>
    %37 = vector.multi_reduction <maximumf>, %36, %cst_23 [1] : vector<8x8x16xf32> to vector<8x16xf32>
    %38 = vector.shape_cast %37 : vector<8x16xf32> to vector<8x1x16xf32>
    %39 = vector.broadcast %38 : vector<8x1x16xf32> to vector<8x8x16xf32>
    %40 = arith.subf %36, %39 : vector<8x8x16xf32>
    %41 = math.exp %40 : vector<8x8x16xf32>
    %cst_24 = arith.constant dense<0.000000e+00> : vector<8x16xf32>
    %42 = vector.multi_reduction <add>, %41, %cst_24 [1] : vector<8x8x16xf32> to vector<8x16xf32>
    %43 = vector.shape_cast %42 : vector<8x16xf32> to vector<8x1x16xf32>
    %44 = vector.broadcast %43 : vector<8x1x16xf32> to vector<8x8x16xf32>
    %45 = arith.divf %41, %44 : vector<8x8x16xf32>
    %46 = arith.truncf %45 : vector<8x8x16xf32> to vector<8x8x16xbf16>
    "tpu.trace_start"() <{level = 10 : i32, message = "bqc,bcd->bqd"}> : () -> ()
    %cst_25 = arith.constant dense<0.000000e+00> : vector<8x8x32xf32>
    %47 = tpu.matmul %46, %1, %cst_25 {dimension_numbers = #tpu.dot_dimension_numbers<[2], [1], [1], [2], [0, 0, 0, 1, 1, 2], [0], [0]>} : vector<8x8x16xbf16>, vector<8x16x32xbf16>, vector<8x8x32xf32> -> vector<8x8x32xf32>
    "tpu.trace_stop"() : () -> ()
    %48 = arith.truncf %47 : vector<8x8x32xf32> to vector<8x8x32xbf16>
    %49 = tpu.concatenate %48, %0 in 2 : vector<8x8x32xbf16>, vector<8x8x32xbf16> -> vector<8x8x64xbf16>
    "tpu.trace_start"() <{level = 10 : i32, message = "bcq,bqe->bce"}> : () -> ()
    %cst_26 = arith.constant dense<0.000000e+00> : vector<8x16x64xf32>
    %50 = tpu.matmul %30, %49, %cst_26 {dimension_numbers = #tpu.dot_dimension_numbers<[2], [1], [1], [2], [0, 0, 0, 1, 1, 2], [0], [0]>} : vector<8x16x8xbf16>, vector<8x8x64xbf16>, vector<8x16x64xf32> -> vector<8x16x64xf32>
    "tpu.trace_stop"() : () -> ()
    %c0_27 = arith.constant 0 : index
    %c0_28 = arith.constant 0 : index
    %c0_29 = arith.constant 0 : index
    %51 = vector.load %arg7[%c0_27, %c0_28, %c0_29] : memref<8x16x64xf32, #tpu.memory_space<vmem>>, vector<8x16x64xf32>
    tpu.vector_store %arg7[%c0_27, %c0_28, %c0_29], %50 {strides = array<i32>} : memref<8x16x64xf32, #tpu.memory_space<vmem>>, vector<8x16x64xf32>,
    return
  }
  func.func @transform_0(%arg0: i32) -> (i32, i32, i32) {
    %c0_i32 = arith.constant 0 : i32
    %c0_i32_0 = arith.constant 0 : i32
    %c0_i32_1 = arith.constant 0 : i32
    return %arg0, %c0_i32, %c0_i32_0 : i32, i32, i32
  }
  func.func @transform_1(%arg0: i32) -> (i32, i32, i32) {
    %c0_i32 = arith.constant 0 : i32
    %c0_i32_0 = arith.constant 0 : i32
    %c0_i32_1 = arith.constant 0 : i32
    return %arg0, %c0_i32, %c0_i32_0 : i32, i32, i32
  }
  func.func @transform_2(%arg0: i32) -> (i32, i32, i32) {
    %c0_i32 = arith.constant 0 : i32
    %c0_i32_0 = arith.constant 0 : i32
    %c0_i32_1 = arith.constant 0 : i32
    return %arg0, %c0_i32, %c0_i32_0 : i32, i32, i32
  }
  func.func @transform_3(%arg0: i32) -> (i32, i32, i32) {
    %c0_i32 = arith.constant 0 : i32
    %c0_i32_0 = arith.constant 0 : i32
    %c0_i32_1 = arith.constant 0 : i32
    return %arg0, %c0_i32, %c0_i32_0 : i32, i32, i32
  }
  func.func @transform_4(%arg0: i32) -> (i32, i32) {
    %c0_i32 = arith.constant 0 : i32
    %c0_i32_0 = arith.constant 0 : i32
    %c0_i32_1 = arith.constant 0 : i32
    return %c0_i32, %c0_i32_0 : i32, i32
  }
  func.func @transform_5(%arg0: i32) -> (i32, i32) {
    %c0_i32 = arith.constant 0 : i32
    %c0_i32_0 = arith.constant 0 : i32
    %c0_i32_1 = arith.constant 0 : i32
    return %c0_i32, %c0_i32_0 : i32, i32
  }
  func.func @transform_6(%arg0: i32) -> (i32, i32, i32) {
    %c0_i32 = arith.constant 0 : i32
    %c0_i32_0 = arith.constant 0 : i32
    %c0_i32_1 = arith.constant 0 : i32
    return %arg0, %c0_i32, %c0_i32_0 : i32, i32, i32
  }
}

</mosaic_0001>

<bundles_post_ra>
// kernel: tpu_custom_call.1
= control target key start
LH: loop header
LB: loop body
LE: loop exit
PB: predicated region body
PF: predicated region fallthrough
CT: control target
= control target key end

     0   :  { %11 = vsyncpa [#allocation3], 0  ;;  %s3776_s0 = inlined_call_operand.hbm [shape: bf16[8,8,32], index: 0, kind: input, shape index: {}]   ;;  %s3777_s1 = inlined_call_operand.hbm [shape: bf16[8,16,32], index: 1, kind: input, shape index: {}]   ;;  %s3778_s2 = inlined_call_operand.hbm [shape: f32[8,1,8], index: 2, kind: input, shape index: {}]   ;;  %s3779_s3 = inlined_call_operand.hbm [shape: f32[8,1,16], index: 3, kind: input, shape index: {}]   ;;  %s3780_s4 = inlined_call_operand.hbm [shape: bf16[32,32], index: 4, kind: input, shape index: {}]   ;;  %s3781_s5 = inlined_call_operand.vmem [shape: f32[1,32], index: 5, kind: input, shape index: {}]   ;;  %s3782_s6 = inlined_call_operand.hbm [shape: f32[8,16,64], index: 6, kind: output, shape index: {}]  }
   0x1   :  { %12 = vsyncpa [#allocation6], 0 }
   0x2   :  { %13 = vsyncpa [#allocation9], 0 }
   0x3   :  { %14 = vsyncpa [#allocation4], 0  ;;  %s2973_s21 = smov [#allocation5]  }
   0x4   :  { %s32_s22 = sshll.u32 %s2973_s21, 4  ;;  %s33_s22 = int_to_ptr.vmem [resolvable:$true] %s32_s22 }
   0x5   :  { %s2853_s23 = scalar_lea.vmem %s33_s22, 1024  ;;  %p2858_p1 = scmp.lt.s32.totalorder %s33_s22, %s33_s22 }
   0x6   :  { %p2854_p0 = scmp.ne.s32.totalorder %s33_s22, %s2853_s23  ;;  %p2859_p2 = scmp.lt.s32.totalorder %s2853_s23, %s2853_s23 }
   0x8   :  { %p2860_p3 = por %p2859_p2, %p2858_p1 }
   0xa   :  { %p2861_p4 = pnand %p2860_p3, %p2854_p0 }
   0xc   :  { %2864 = shalt.err (!%p2861_p4)
}
   0xd   :  { %s2974_s24 = smov 64   ;;  %s2975_s25 = smov 4  }
   0xe   :  { %38 = dma.hbm_to_vmem [thread:$0]  %s3777_s1, 1024, %s33_s22, [#allocation6], %s2974_s24, %s2974_s24, %s2975_s25  }
   0xf   :  { %s2976_s28 = smov [#allocation8]   ;;  %s2977_s30 = smov [#allocation2]  }
  0x10   :  { %s56_s29 = sshll.u32 %s2976_s28, 4  ;;  %s20_s7 = sshll.u32 %s2977_s30, 4  ;;  %s57_s29 = int_to_ptr.vmem [resolvable:$true] %s56_s29  ;;  %s21_s7 = int_to_ptr.vmem [resolvable:$true] %s20_s7 }
  0x11   :  { %s2873_s8 = scalar_lea.vmem %s57_s29, 128  ;;  %p2878_p6 = scmp.lt.s32.totalorder %s57_s29, %s57_s29 }
  0x12   :  { %p2874_p5 = scmp.ne.s32.totalorder %s57_s29, %s2873_s8  ;;  %p2879_p7 = scmp.lt.s32.totalorder %s2873_s8, %s2873_s8 }
  0x14   :  { %p2880_p8 = por %p2879_p7, %p2878_p6 }
  0x16   :  { %p2881_p9 = pnand %p2880_p8, %p2874_p5 }
  0x18   :  { %2884 = shalt.err (!%p2881_p9)
}
  0x19   :  { %s2978_s9 = smov 16   ;;  %s2979_s10 = smov 1  }
  0x1a   :  { %62 = dma.hbm_to_vmem [thread:$0]  %s3779_s3, 128, %s57_s29, [#allocation9], %s2978_s9, %s2978_s9, %s2979_s10  }
  0x1b   :  { %s2893_s1 = scalar_lea.vmem %s21_s7, 512  ;;  %p2898_p11 = scmp.lt.s32.totalorder %s21_s7, %s21_s7 }
  0x1c   :  { %p2894_p10 = scmp.ne.s32.totalorder %s21_s7, %s2893_s1  ;;  %p2899_p12 = scmp.lt.s32.totalorder %s2893_s1, %s2893_s1 }
  0x1e   :  { %p2900_p13 = por %p2899_p12, %p2898_p11 }
  0x20   :  { %p2901_p0 = pnand %p2900_p13, %p2894_p10 }
  0x22   :  { %2904 = shalt.err (!%p2901_p0)
}
  0x23   :  { %26 = dma.hbm_to_vmem [thread:$0]  %s3776_s0, 512, %s21_s7, [#allocation3], %s2974_s24, %s2974_s24, %s2975_s25  }
  0x24   :  { %s2980_s15 = smov [#allocation7]   ;;  %s2981_s17 = smov [#allocation10]  }
  0x25   :  { %s44_s16 = sshll.u32 %s2980_s15, 4  ;;  %s68_s3 = sshll.u32 %s2981_s17, 4  ;;  %s45_s16 = int_to_ptr.vmem [resolvable:$true] %s44_s16  ;;  %s69_s3 = int_to_ptr.vmem [resolvable:$true] %s68_s3 }
  0x26   :  { %s2913_s18 = scalar_lea.vmem %s45_s16, 128  ;;  %p2918_p2 = scmp.lt.s32.totalorder %s45_s16, %s45_s16 }
  0x27   :  { %p2914_p1 = scmp.ne.s32.totalorder %s45_s16, %s2913_s18  ;;  %p2919_p3 = scmp.lt.s32.totalorder %s2913_s18, %s2913_s18 }
  0x29   :  { %p2920_p4 = por %p2919_p3, %p2918_p2 }
  0x2b   :  { %p2921_p5 = pnand %p2920_p4, %p2914_p1 }
  0x2d   :  { %2924 = shalt.err (!%p2921_p5)
}
  0x2e   :  { %50 = dma.hbm_to_vmem [thread:$0]  %s3778_s2, 128, %s45_s16, [#allocation6], %s2978_s9, %s2978_s9, %s2979_s10  }
  0x2f   :  { %s2933_s21 = scalar_lea.vmem %s69_s3, 256  ;;  %p2938_p7 = scmp.lt.s32.totalorder %s69_s3, %s69_s3 }
  0x30   :  { %p2934_p6 = scmp.ne.s32.totalorder %s69_s3, %s2933_s21  ;;  %p2939_p8 = scmp.lt.s32.totalorder %s2933_s21, %s2933_s21 }
  0x32   :  { %p2940_p9 = por %p2939_p8, %p2938_p7 }
  0x34   :  { %p2941_p10 = pnand %p2940_p9, %p2934_p6 }
  0x36   :  { %2944 = shalt.err (!%p2941_p10)
}
  0x37   :  { %74 = dma.hbm_to_vmem [thread:$0]  %s3780_s4, 256, %s69_s3, [#allocation9], %s2974_s24, %s2974_s24, %s2975_s25  }
  0x38   :  { %2965 = dma.done.wait [#allocation3], 512  }
  0x39   :  { %2966 = vsyncadd [#allocation3], 4294966784 }
  0x3a   :  { %2967 = dma.done.wait [#allocation6], 1152  }
  0x3b   :  { %2968 = vsyncadd [#allocation6], 4294966144 }
  0x3c   :  { %2969 = dma.done.wait [#allocation9], 384  }
  0x3d   :  { %2970 = vsyncadd [#allocation9], 4294966912  ;;  %v2722_v0 = vld [vmem:[#allocation10 + $0x8] sm:$0xff]   ;;  %v2723_v1 = vld [vmem:[#allocation10] sm:$0xff]   ;;  %vm176_vm0 = vcmask 261120   ;;  %v2982_v16 = vmov 0.0  }
  0x3e   :  { %2502 = vmatprep.subr.bf16.mxu0 %v2722_v0  ;;  %v3048_v2 = vld [vmem:[#allocation2] sm:$0xf]  ;;  %v3050_v3 = vld [vmem:[#allocation2 + $0x4] sm:$0xf]  ;;  %v3054_v5 = vld [vmem:[#allocation2 + $0x8] sm:$0xf]  ;;  %2514 = vmatprep.subr.bf16.mxu1 %v2982_v16 }
  0x3f   :  { %2503 = vmatpush3.bf16.msra.mxu0 %v2722_v0  ;;  %v2358_v4 = vcombine.low %v3048_v2, %v3050_v3  ;;  %v3056_v6 = vld [vmem:[#allocation2 + $0xc] sm:$0xf]  ;;  %v3058_v7 = vld [vmem:[#allocation2 + $0x10] sm:$0xf]  ;;  %v3060_v8 = vld [vmem:[#allocation2 + $0x14] sm:$0xf] }
  0x40   :  { %2504 = vmatprep.subr.bf16.mxu0 %v2723_v1  ;;  %v2359_v9 = vcombine.low %v3054_v5, %v3056_v6  ;;  %v2360_v10 = vcombine.low %v3058_v7, %v3060_v8  ;;  %v3069_v11 = vld [vmem:[#allocation2 + $0x18] sm:$0xf]  ;;  %v3071_v12 = vld [vmem:[#allocation2 + $0x1c] sm:$0xf]  ;;  %v3076_v14 = vld [vmem:[#allocation5 + $0x10] sm:$0xff]   ;;  %vm2983_vm1 = vmmov 0  }
  0x41   :  { %2506 = vmatprep.mubr.msk.bf16.mxu0 %vm176_vm0, %v2358_v4  ;;  %v2361_v13 = vcombine.low %v3069_v11, %v3071_v12  ;;  %v3078_v15 = vld [vmem:[#allocation5] sm:$0xff]   ;;  %v397_v17 = vsel %vm176_vm0, %v3076_v14, 0  ;;  %2516 = vmatprep.mubr.msk.bf16.mxu1 %vm2983_vm1, %v2982_v16  ;;  %v3097_v33 = vld [vmem:[#allocation5 + $0x8] sm:$0xff]   ;;  %v3110_v42 = vld [vmem:[#allocation5 + $0x18] sm:$0xff]   ;;  %vm1383_vm7 = vcmask 130048   ;;  %s2986_s23 = smov [#allocation11]  }
  0x42   :  { %v295_v18 = vsel %vm176_vm0, %v3078_v15, 0  ;;  %v2357_v19 = vld [vmem:[%s3781_s5] ss:$0 sm:$0xff]  ;;  %v346_v40 = vsel %vm176_vm0, %v3097_v33, 0  ;;  %v3113_v44 = vld [vmem:[#allocation5 + $0x30] sm:$0xff]   ;;  %v448_v47 = vsel %vm176_vm0, %v3110_v42, 0 }
  0x43   :  { %2505 = vmatpush3.bf16.msra.mxu0 %v2723_v1  ;;  %2515 = vmatpush3.bf16.xpose.msra.mxu1 %v295_v18  ;;  %v3095_v31 = vld [vmem:[#allocation5 + $0x20] sm:$0xff]   ;;  %v601_v50 = vsel %vm176_vm0, %v3113_v44, 0  ;;  %v2735_v53 = vld [vmem:[#allocation5 + $0x28] sm:$0xff]   ;;  %v2736_v59 = vld [vmem:[#allocation5 + $0x38] sm:$0xff]   ;;  %v2410_v18 = vcombine.low %v3054_v5, %v3054_v5  ;;  %s2984_s5 = smov 32   ;;  %s2343_s24 = sshll.u32 %s2986_s23, 4  ;;  %s2344_s24 = int_to_ptr.vmem [resolvable:$true] %s2343_s24 }
  0x44   :  { %2526 = vmatprep.subr.bf16.mxu0 %v2982_v16  ;;  %2520 = vmatprep.subr.bf16.mxu1 %v2982_v16  ;;  %v499_v37 = vsel %vm176_vm0, %v3095_v31, 0  ;;  %v550_v57 = vsel %vm176_vm0, %v2735_v53, 0  ;;  %v652_v62 = vsel %vm176_vm0, %v2736_v59, 0  ;;  %v127_v5 = vld [vmem:[#allocation8 + $0x2] sm:$0x1]  ;;  %s2945_s25 = scalar_lea.vmem %s2344_s24, 2048  ;;  %p2950_p12 = scmp.lt.s32.totalorder %s2344_s24, %s2344_s24 }
  0x45   :  { %1916 = vrot.lane.b32.xlu1 %v2410_v18, %s2984_s5  ;;  %vm1321_vm2 = vcmp.ne.f32.partialorder %v127_v5, 0.0  ;;  %p2946_p11 = scmp.ne.s32.totalorder %s2344_s24, %s2945_s25  ;;  %p2951_p13 = scmp.lt.s32.totalorder %s2945_s25, %s2945_s25 }
  0x46   :  { %2507 = vmatmul.mubr.msk.bf16.vlgmr.msra.gmra.mxu0 %vm176_vm0, %v2359_v9 }
  0x47   :  { %2510 = vmatprep.mubr.msk.bf16.mxu0 %vm176_vm0, %v2360_v10  ;;  %2527 = vmatpush3.bf16.xpose.msra.mxu0 %v397_v17  ;;  %p2952_p0 = por %p2951_p13, %p2950_p12 }
  0x48   :  { %2538 = vmatprep.subr.bf16.mxu0 %v2982_v16 }
  0x49   :  { %p2953_p1 = pnand %p2952_p0, %p2946_p11 }
  0x4e   :  { %2511 = vmatmul.mubr.msk.bf16.gmra.mxu0 %vm176_vm0, %v2361_v13 }
  0x4f   :  { %2528 = vmatprep.mubr.msk.bf16.mxu0 %vm2983_vm1, %v2982_v16 }
 0x106   :  { %v2508_v20 = vpop.f32.mrf.mxu0 }
 0x107   :  { %v232_v21 = vadd.f32 %v2508_v20, %v2357_v19  ;;  %v2411_v20 = vcombine.low %v3056_v6, %v3056_v6  ;;  %v125_v6 = vld [vmem:[#allocation8] sm:$0x1] }
 0x108   :  { %v223_v22 = vpop.f32.mrf.mxu0  ;;  %vm1319_vm3 = vcmp.ne.f32.partialorder %v125_v6, 0.0 }
 0x109   :  { %2744 = vtanh.f32 %v232_v21  ;;  %v224_v23 = vadd.f32 %v2357_v19, %v223_v22  ;;  %1918 = vrot.lane.b32.xlu1 %v2411_v20, %s2984_s5  ;;  %v2412_v21 = vcombine.low %v3058_v7, %v3058_v7  ;;  %v1038_v22 = vlaneseq }
 0x10a   :  { %v2509_v24 = vpop.f32.mrf.mxu0  ;;  %v2985_v7 = vmov 0  }
 0x10b   :  { %2746 = vtanh.f32 %v224_v23  ;;  %v235_v32 = vadd.f32 %v2509_v24, %v2357_v19  ;;  %v2415_v23 = vcombine.low %v3071_v12, %v3071_v12  ;;  %v1039_v24 = vshrl.u32 %v1038_v22, 7 }
 0x10c   :  { %v226_v25 = vpop.f32.mrf.mxu0 }
 0x10d   :  { %v227_v26 = vadd.f32 %v2357_v19, %v226_v25  ;;  %v3209_v25 = vsub.s32 0, %v1039_v24 }
 0x10e   :  { %v2512_v27 = vpop.f32.mrf.mxu0 }
 0x10f   :  { %2748 = vtanh.f32 %v227_v26  ;;  %v248_v30 = vadd.f32 %v2512_v27, %v2357_v19  ;;  %v1327_v26 = vsel %vm1319_vm3, 1, %v2985_v7 }
 0x110   :  { %v239_v28 = vpop.f32.mrf.mxu0 }
 0x111   :  { %v240_v29 = vadd.f32 %v2357_v19, %v239_v28  ;;  %v129_v28 = vld [vmem:[#allocation8 + $0x4] sm:$0x1] }
 0x112   :  { %v2513_v35 = vpop.f32.mrf.mxu0  ;;  %vm1323_vm6 = vcmp.ne.f32.partialorder %v129_v28, 0.0  ;;  %v123_v28 = vld [vmem:[#allocation7 + $0x6] sm:$0x1] }
 0x113   :  { %2750 = vtanh.f32 %v240_v29  ;;  %v251_v52 = vadd.f32 %v2513_v35, %v2357_v19  ;;  %v1338_v29 = vrot.slane %v1327_v26, %v3209_v25  ;;  %v118_v26 = vld [vmem:[#allocation7 + $0x1] sm:$0x1] }
 0x114   :  { %2752 = vtanh.f32 %v248_v30  ;;  %v242_v41 = vpop.f32.mrf.mxu0 }
 0x115   :  { %2754 = vtanh.f32 %v235_v32  ;;  %v243_v43 = vadd.f32 %v2357_v19, %v242_v41  ;;  %v2409_v19 = vcombine.low %v3050_v3, %v3050_v3  ;;  %v2414_v3 = vcombine.low %v3069_v11, %v3069_v11  ;;  %v126_v11 = vld [vmem:[#allocation8 + $0x1] sm:$0x1] }
 0x116   :  { %v2745_v34 = vpop.eup %2744  ;;  %vm1320_vm5 = vcmp.ne.f32.partialorder %v126_v11, 0.0  ;;  %vm1367_vm8 = vcmp.eq.s32.totalorder %v1338_v29, 1  ;;  %v1331_v32 = vsel %vm1323_vm6, 1, %v2985_v7 }
 0x117   :  { %v2426_v36 = vpack.c.bf16 %v2745_v34, %v2745_v34  ;;  %2756 = vtanh.f32 %v243_v43 }
 0x118   :  { %v2747_v38 = vpop.eup %2746  ;;  %2758 = vtanh.f32 %v251_v52 }
 0x119   :  { %v2424_v39 = vpack.c.bf16 %v2747_v38, %v2747_v38  ;;  %2529 = vmatmul.mubr.msk.bf16.vlgmr.msra.gmra.mxu0 %vm176_vm0, %v2426_v36  ;;  %v394_v63 = vsel %vm176_vm0, %v2426_v36, 0 }
 0x11a   :  { %2539 = vmatpush3.bf16.xpose.msra.mxu0 %v499_v37  ;;  %2540 = vmatprep.mubr.msk.bf16.mxu0 %vm2983_vm1, %v2982_v16 }
 0x11b   :  { %2517 = vmatmul.mubr.msk.bf16.vlgmr.msra.gmra.mxu1 %vm176_vm0, %v2424_v39  ;;  %2550 = vmatprep.subr.bf16.mxu0 %v2982_v16  ;;  %v292_v58 = vsel %vm176_vm0, %v2424_v39, 0  ;;  %v131_v39 = vld [vmem:[#allocation8 + $0x6] sm:$0x1] }
 0x11c   :  { %2521 = vmatpush3.bf16.xpose.msra.mxu1 %v346_v40  ;;  %2522 = vmatprep.mubr.msk.bf16.mxu1 %vm2983_vm1, %v2982_v16  ;;  %v2749_v45 = vpop.eup %2748  ;;  %vm1325_vm10 = vcmp.ne.f32.partialorder %v131_v39, 0.0 }
 0x11d   :  { %2532 = vmatprep.subr.bf16.mxu1 %v2982_v16  ;;  %v2425_v48 = vpack.c.bf16 %v2749_v45, %v2749_v45  ;;  %v1354_v45 = vrot.slane %v1331_v32, %v3209_v25 }
 0x11f   :  { %v343_v4 = vsel %vm176_vm0, %v2425_v48, 0  ;;  %vm1371_vm12 = vcmp.eq.s32.totalorder %v1354_v45, 1 }
 0x120   :  { %v2751_v46 = vpop.eup %2750 }
 0x121   :  { %v2428_v49 = vpack.c.bf16 %v2751_v46, %v2751_v46  ;;  %v2753_v51 = vpop.eup %2752 }
 0x122   :  { %v2755_v54 = vpop.eup %2754  ;;  %v2430_v55 = vpack.c.bf16 %v2753_v51, %v2753_v51 }
 0x123   :  { %2523 = vmatmul.mubr.msk.bf16.vlgmr.msra.gmra.mxu1 %vm176_vm0, %v2425_v48  ;;  %2541 = vmatmul.mubr.msk.bf16.vlgmr.msra.gmra.mxu0 %vm176_vm0, %v2428_v49  ;;  %v2427_v56 = vpack.c.bf16 %v2755_v54, %v2755_v54  ;;  %v496_v9 = vsel %vm176_vm0, %v2428_v49, 0  ;;  %v132_v54 = vld [vmem:[#allocation8 + $0x7] sm:$0x1] }
 0x124   :  { %2533 = vmatpush3.bf16.xpose.msra.mxu1 %v448_v47  ;;  %2551 = vmatpush3.bf16.xpose.msra.mxu0 %v601_v50  ;;  %v2757_v60 = vpop.eup %2756  ;;  %v598_v13 = vsel %vm176_vm0, %v2430_v55, 0  ;;  %vm1326_vm14 = vcmp.ne.f32.partialorder %v132_v54, 0.0 }
 0x125   :  { %2534 = vmatprep.mubr.msk.bf16.mxu1 %vm2983_vm1, %v2982_v16  ;;  %2544 = vmatprep.subr.bf16.mxu1 %v2982_v16  ;;  %v2429_v61 = vpack.c.bf16 %v2757_v60, %v2757_v60  ;;  %v2759_v0 = vpop.eup %2758  ;;  %v445_v10 = vsel %vm176_vm0, %v2427_v56, 0  ;;  %v1334_v5 = vsel %vm1326_vm14, 1, %v2985_v7 }
 0x126   :  { %2552 = vmatprep.mubr.msk.bf16.mxu0 %vm2983_vm1, %v2982_v16  ;;  %2562 = vmatprep.subr.bf16.mxu0 %v2982_v16  ;;  %v2431_v1 = vpack.c.bf16 %v2759_v0, %v2759_v0  ;;  %v1366_v39 = vrot.slane %v1334_v5, %v3209_v25 }
 0x128   :  { %v649_v17 = vsel %vm176_vm0, %v2431_v1, 0 }
 0x12b   :  { %2535 = vmatmul.mubr.msk.bf16.vlgmr.msra.gmra.mxu1 %vm176_vm0, %v2427_v56  ;;  %2553 = vmatmul.mubr.msk.bf16.vlgmr.msra.gmra.mxu0 %vm176_vm0, %v2430_v55 }
 0x12c   :  { %2545 = vmatpush3.bf16.xpose.msra.mxu1 %v550_v57  ;;  %2563 = vmatpush3.bf16.xpose.msra.mxu0 %v292_v58  ;;  %v1333_v58 = vsel %vm1325_vm10, 1, %v2985_v7  ;;  %vm1094_vm10 = vcmask 64512  }
 0x12d   :  { %2546 = vmatprep.mubr.msk.bf16.mxu1 %vm2983_vm1, %v2982_v16  ;;  %2556 = vmatprep.subr.bf16.mxu1 %v2982_v16 }
 0x12e   :  { %2564 = vmatprep.mubr.msk.bf16.mxu0 %vm2983_vm1, %v2982_v16  ;;  %2574 = vmatprep.subr.bf16.mxu0 %v2982_v16 }
 0x133   :  { %2547 = vmatmul.mubr.msk.bf16.vlgmr.msra.gmra.mxu1 %vm176_vm0, %v2429_v61  ;;  %2565 = vmatmul.mubr.msk.bf16.vlgmr.msra.gmra.mxu0 %vm176_vm0, %v3078_v15 }
 0x134   :  { %2557 = vmatpush3.bf16.xpose.msra.mxu1 %v652_v62  ;;  %2575 = vmatpush3.bf16.xpose.msra.mxu0 %v394_v63  ;;  %v119_v63 = vld [vmem:[#allocation7 + $0x2] sm:$0x1] }
 0x135   :  { %2558 = vmatprep.mubr.msk.bf16.mxu1 %vm2983_vm1, %v2982_v16  ;;  %2568 = vmatprep.subr.bf16.mxu1 %v2982_v16 }
 0x136   :  { %2576 = vmatprep.mubr.msk.bf16.mxu0 %vm2983_vm1, %v2982_v16  ;;  %2586 = vmatprep.subr.bf16.mxu0 %v2982_v16 }
 0x13b   :  { %2559 = vmatmul.mubr.msk.bf16.vlgmr.msra.gmra.mxu1 %vm176_vm0, %v2431_v1  ;;  %2577 = vmatmul.mubr.msk.bf16.vlgmr.msra.gmra.mxu0 %vm176_vm0, %v3076_v14  ;;  %v547_v14 = vsel %vm176_vm0, %v2429_v61, 0 }
 0x13c   :  { %2569 = vmatpush3.bf16.xpose.msra.mxu1 %v343_v4  ;;  %2587 = vmatpush3.bf16.xpose.msra.mxu0 %v496_v9 }
 0x13d   :  { %2570 = vmatprep.mubr.msk.bf16.mxu1 %vm2983_vm1, %v2982_v16  ;;  %2580 = vmatprep.subr.bf16.mxu1 %v2982_v16 }
 0x13e   :  { %2588 = vmatprep.mubr.msk.bf16.mxu0 %vm2983_vm1, %v2982_v16  ;;  %2598 = vmatprep.subr.bf16.mxu0 %v2982_v16 }
 0x143   :  { %2571 = vmatmul.mubr.msk.bf16.vlgmr.msra.gmra.mxu1 %vm176_vm0, %v3097_v33  ;;  %2589 = vmatmul.mubr.msk.bf16.vlgmr.msra.gmra.mxu0 %vm176_vm0, %v3095_v31  ;;  %v1328_v31 = vsel %vm1320_vm5, 1, %v2985_v7  ;;  %vm1023_vm5 = vcmp.ne.f32.partialorder %v118_v26, 0.0 }
 0x144   :  { %2581 = vmatpush3.bf16.xpose.msra.mxu1 %v445_v10  ;;  %2599 = vmatpush3.bf16.xpose.msra.mxu0 %v598_v13 }
 0x145   :  { %2582 = vmatprep.mubr.msk.bf16.mxu1 %vm2983_vm1, %v2982_v16  ;;  %2592 = vmatprep.subr.bf16.mxu1 %v2982_v16 }
 0x146   :  { %2600 = vmatprep.mubr.msk.bf16.mxu0 %vm2983_vm1, %v2982_v16  ;;  %2610 = vmatprep.subr.bf16.mxu0 %v2982_v16 }
 0x14b   :  { %2583 = vmatmul.mubr.msk.bf16.vlgmr.msra.gmra.mxu1 %vm176_vm0, %v3110_v42  ;;  %2601 = vmatmul.mubr.msk.bf16.vlgmr.msra.gmra.mxu0 %vm176_vm0, %v3113_v44  ;;  %v1342_v44 = vrot.slane %v1328_v31, %v3209_v25 }
 0x14c   :  { %2593 = vmatpush3.bf16.xpose.msra.mxu1 %v547_v14  ;;  %2594 = vmatprep.mubr.msk.bf16.mxu1 %vm2983_vm1, %v2982_v16 }
 0x14d   :  { %2604 = vmatprep.subr.bf16.mxu1 %v2982_v16  ;;  %2611 = vmatpush3.bf16.msra.mxu0 %v3078_v15  ;;  %v2408_v15 = vcombine.low %v3048_v2, %v3048_v2  ;;  %v2413_v2 = vcombine.low %v3060_v8, %v3060_v8  ;;  %v1329_v8 = vsel %vm1321_vm2, 1, %v2985_v7  ;;  %vm1368_vm11 = vcmp.eq.s32.totalorder %v1342_v44, 1 }
 0x14e   :  { %2612 = vmatprep.mubr.msk.bf16.mxu0 %vm2983_vm1, %v2982_v16  ;;  %2622 = vmatprep.subr.bf16.mxu0 %v2982_v16  ;;  %v1346_v27 = vrot.slane %v1329_v8, %v3209_v25  ;;  %vm1024_vm2 = vcmp.ne.f32.partialorder %v119_v63, 0.0  ;;  %v122_v63 = vld [vmem:[#allocation7 + $0x5] sm:$0x1] }
 0x14f   :  { %1912 = vrot.lane.b32.xlu0 %v2408_v15, %s2984_s5  ;;  %1922 = vrot.lane.b32.xlu1 %v2413_v2, %s2984_s5  ;;  %v1362_v15 = vrot.slane %v1333_v58, %v3209_v25  ;;  %vm1027_vm14 = vcmp.ne.f32.partialorder %v122_v63, 0.0 }
 0x150   :  { %vm1369_vm4 = vcmp.eq.s32.totalorder %v1346_v27, 1 }
 0x153   :  { %2595 = vmatmul.mubr.msk.bf16.vlgmr.msra.gmra.mxu1 %vm176_vm0, %v2735_v53  ;;  %1914 = vrot.lane.b32.xlu0 %v2409_v19, %s2984_s5  ;;  %v130_v53 = vld [vmem:[#allocation8 + $0x5] sm:$0x1] }
 0x154   :  { %2605 = vmatpush3.bf16.xpose.msra.mxu1 %v649_v17  ;;  %2606 = vmatprep.mubr.msk.bf16.mxu1 %vm2983_vm1, %v2982_v16  ;;  %vm1324_vm13 = vcmp.ne.f32.partialorder %v130_v53, 0.0 }
 0x155   :  { %2616 = vmatprep.subr.bf16.mxu1 %v2982_v16  ;;  %1926 = vrot.lane.b32.xlu1 %v2415_v23, %s2984_s5 }
 0x157   :  { %1920 = vrot.lane.b32.xlu0 %v2412_v21, %s2984_s5 }
 0x15b   :  { %2607 = vmatmul.mubr.msk.bf16.vlgmr.msra.gmra.mxu1 %vm176_vm0, %v2736_v59  ;;  %1924 = vrot.lane.b32.xlu0 %v2414_v3, %s2984_s5  ;;  %v117_v59 = vld [vmem:[#allocation7] sm:$0x1]  ;;  %v1332_v3 = vsel %vm1324_vm13, 1, %v2985_v7 }
 0x15c   :  { %2617 = vmatpush3.bf16.msra.mxu1 %v3097_v33  ;;  %2618 = vmatprep.mubr.msk.bf16.mxu1 %vm2983_vm1, %v2982_v16  ;;  %v128_v33 = vld [vmem:[#allocation8 + $0x3] sm:$0x1]  ;;  %vm1022_vm15 = vcmp.ne.f32.partialorder %v117_v59, 0.0 }
 0x15d   :  { %2628 = vmatprep.subr.bf16.mxu1 %v2982_v16  ;;  %vm1322_vm9 = vcmp.ne.f32.partialorder %v128_v33, 0.0 }
 0x15e   :  { %v1330_v52 = vsel %vm1322_vm9, 1, %v2985_v7  ;;  %vm3279_vm9 = vcmp.eq.s32.totalorder %v1366_v39, 1 }
 0x15f   :  { %v1350_v62 = vrot.slane %v1330_v52, %v3209_v25  ;;  %v121_v52 = vld [vmem:[#allocation7 + $0x4] sm:$0x1] }
 0x161   :  { %vm3244_vm3 = vcmp.eq.s32.totalorder %v1350_v62, 1  ;;  %v1031_v62 = vsel %vm1023_vm5, 1, %v2985_v7 }
 0x1d9   :  { %v433_v12 = vpop.f32.mrf.mxu0 }
 0x1da   :  { %v3215_v30 = vsel %vm1369_vm4, %v433_v12, -1e+30  ;;  %vm3248_vm4 = vcmp.eq.s32.totalorder %v1362_v15, 1  ;;  %v1030_v12 = vsel %vm1022_vm15, 1, %v2985_v7  ;;  %vm1028_vm15 = vcmp.ne.f32.partialorder %v123_v28, 0.0 }
 0x1db   :  { %v1398_v34 = vsel %vm1383_vm7, %v3215_v30, -inf  ;;  %v331_v35 = vpop.f32.mrf.mxu1  ;;  %v2530_v36 = vpop.f32.mrf.mxu0 }
 0x1dc   :  { %v1399_v37 = vrot.slane %v1398_v34, 4  ;;  %v3221_v38 = vsel %vm1367_vm8, %v331_v35, -1e+30 }
 0x1dd   :  { %v1384_v40 = vsel %vm1383_vm7, %v3221_v38, -inf  ;;  %v2518_v41 = vpop.f32.mrf.mxu1  ;;  %v436_v43 = vpop.f32.mrf.mxu0 }
 0x1de   :  { %v1400_v46 = vmax.f32 %v1398_v34, %v1399_v37  ;;  %v1385_v47 = vrot.slane %v1384_v40, 4  ;;  %v120_v34 = vld [vmem:[#allocation7 + $0x3] sm:$0x1]  ;;  %v1358_v37 = vrot.slane %v1332_v3, %v3209_v25 }
 0x1df   :  { %v334_v48 = vpop.f32.mrf.mxu1  ;;  %v2531_v49 = vpop.f32.mrf.mxu0  ;;  %vm1025_vm6 = vcmp.ne.f32.partialorder %v120_v34, 0.0 }
 0x1e0   :  { %v1401_v50 = vrot.slane %v1400_v46, 2  ;;  %v1386_v51 = vmax.f32 %v1384_v40, %v1385_v47  ;;  %v1032_v40 = vsel %vm1024_vm2, 1, %v2985_v7  ;;  %v1041_v48 = vrot.slane %v1030_v12, %v3209_v25 }
 0x1e1   :  { %v2519_v55 = vpop.f32.mrf.mxu1  ;;  %vm3272_vm8 = vcmp.eq.s32.totalorder %v1358_v37, 1  ;;  %v1049_v58 = vrot.slane %v1032_v40, %v3209_v25 }
 0x1e2   :  { %v1402_v56 = vmax.f32 %v1400_v46, %v1401_v50  ;;  %v1387_v57 = vrot.slane %v1386_v51, 2 }
 0x1e3   :  { %v382_v60 = vpop.f32.mrf.mxu1  ;;  %v535_v61 = vpop.f32.mrf.mxu0  ;;  %vm3294_vm13 = vcmp.eq.s32.totalorder %v1049_v58, 1 }
 0x1e4   :  { %v1403_v0 = vrot.slane %v1402_v56, 1  ;;  %v1388_v1 = vmax.f32 %v1386_v51, %v1387_v57  ;;  %v3230_v4 = vsel %vm1368_vm11, %v382_v60, -1e+30  ;;  %v3232_v9 = vsel %vm1371_vm12, %v535_v61, -1e+30 }
 0x1e5   :  { %v1391_v10 = vsel %vm1383_vm7, %v3230_v4, -inf  ;;  %v1412_v13 = vsel %vm1383_vm7, %v3232_v9, -inf  ;;  %v2524_v14 = vpop.f32.mrf.mxu1  ;;  %v2542_v17 = vpop.f32.mrf.mxu0  ;;  %vm1026_vm11 = vcmp.ne.f32.partialorder %v121_v52, 0.0  ;;  %vm3289_vm12 = vcmp.eq.s32.totalorder %v1041_v48, 1 }
 0x1e6   :  { %v1404_v18 = vmax.f32 %v1402_v56, %v1403_v0  ;;  %v1389_v19 = vrot.slane %v1388_v1, 1  ;;  %v1392_v20 = vrot.slane %v1391_v10, 4  ;;  %v1413_v21 = vrot.slane %v1412_v13, 4 }
 0x1e7   :  { %v385_v2 = vpop.f32.mrf.mxu1  ;;  %v538_v22 = vpop.f32.mrf.mxu0  ;;  %v3285_v14 = vsel %vm1025_vm6, 1, %v2985_v7 }
 0x1e8   :  { %v1442_v23 = vsub.f32 %v3215_v30, %v1404_v18  ;;  %v1390_v24 = vmax.f32 %v1388_v1, %v1389_v19  ;;  %v1393_v6 = vmax.f32 %v1391_v10, %v1392_v20  ;;  %v1414_v8 = vmax.f32 %v1412_v13, %v1413_v21 }
 0x1e9   :  { %v2525_v27 = vpop.f32.mrf.mxu1  ;;  %v2543_v11 = vpop.f32.mrf.mxu0  ;;  %v1045_v22 = vrot.slane %v1031_v62, %v3209_v25 }
 0x1ea   :  { %v1452_v31 = vmul.f32 1.442695, %v1442_v23  ;;  %v1440_v30 = vsub.f32 %v3221_v38, %v1390_v24  ;;  %v1394_v32 = vrot.slane %v1393_v6, 2  ;;  %v1415_v33 = vrot.slane %v1414_v8, 2 }
 0x1eb   :  { %v484_v35 = vpop.f32.mrf.mxu1  ;;  %v637_v36 = vpop.f32.mrf.mxu0  ;;  %v1053_v11 = vrot.slane %v3285_v14, %v3209_v25  ;;  %vm3326_vm2 = vcmp.eq.s32.totalorder %v1045_v22, 1 }
 0x1ec   :  { %2760 = vpow2.f32 %v1452_v31  ;;  %v1448_v41 = vmul.f32 1.442695, %v1440_v30  ;;  %v1395_v43 = vmax.f32 %v1393_v6, %v1394_v32  ;;  %v1416_v44 = vmax.f32 %v1414_v8, %v1415_v33 }
 0x1ed   :  { %v3261_v38 = vsel %vm3244_vm3, %v484_v35, -1e+30  ;;  %v3265_v45 = vsel %vm3248_vm4, %v637_v36, -1e+30  ;;  %v2536_v46 = vpop.f32.mrf.mxu1  ;;  %v2554_v47 = vpop.f32.mrf.mxu0  ;;  %v3314_v31 = vsel %vm1027_vm14, 1, %v2985_v7  ;;  %vm3361_vm4 = vcmp.eq.s32.totalorder %v1053_v11, 1 }
 0x1ee   :  { %2762 = vpow2.f32 %v1448_v41  ;;  %v1396_v49 = vrot.slane %v1395_v43, 1  ;;  %v1417_v50 = vrot.slane %v1416_v44, 1  ;;  %v1405_v51 = vsel %vm1383_vm7, %v3261_v38, -inf  ;;  %v124_v36 = vld [vmem:[#allocation7 + $0x7] sm:$0x1] }
 0x1ef   :  { %v1406_v53 = vrot.slane %v1405_v51, 4  ;;  %v1426_v54 = vsel %vm1383_vm7, %v3265_v45, -inf  ;;  %v487_v55 = vpop.f32.mrf.mxu1  ;;  %v640_v56 = vpop.f32.mrf.mxu0  ;;  %vm1029_vm3 = vcmp.ne.f32.partialorder %v124_v36, 0.0 }
 0x1f0   :  { %v1397_v59 = vmax.f32 %v1395_v43, %v1396_v49  ;;  %v1418_v60 = vmax.f32 %v1416_v44, %v1417_v50  ;;  %v1427_v61 = vrot.slane %v1426_v54, 4  ;;  %v1061_v50 = vrot.slane %v3314_v31, %v3209_v25 }
 0x1f1   :  { %v1407_v0 = vmax.f32 %v1405_v51, %v1406_v53  ;;  %v2537_v1 = vpop.f32.mrf.mxu1  ;;  %v2555_v10 = vpop.f32.mrf.mxu0 }
 0x1f2   :  { %v1441_v17 = vsub.f32 %v3230_v4, %v1397_v59  ;;  %v1444_v15 = vsub.f32 %v3232_v9, %v1418_v60  ;;  %v1428_v18 = vmax.f32 %v1426_v54, %v1427_v61  ;;  %v3299_v9 = vsel %vm1026_vm11, 1, %v2985_v7 }
 0x1f3   :  { %v1408_v20 = vrot.slane %v1407_v0, 2  ;;  %v586_v21 = vpop.f32.mrf.mxu1  ;;  %v728_v2 = vpop.f32.mrf.mxu0  ;;  %v1057_v40 = vrot.slane %v3299_v9, %v3209_v25  ;;  %v3341_v60 = vsel %vm1028_vm15, 1, %v2985_v7  ;;  %vm3412_vm6 = vcmp.eq.s32.totalorder %v1061_v50, 1 }
 0x1f4   :  { %v1450_v5 = vmul.f32 1.442695, %v1441_v17  ;;  %v1456_v23 = vmul.f32 1.442695, %v1444_v15  ;;  %v1429_v4 = vrot.slane %v1428_v18, 2  ;;  %vm2321_vm11 = vcmask 523264  }
 0x1f5   :  { %v1409_v24 = vmax.f32 %v1407_v0, %v1408_v20  ;;  %v3303_v6 = vsel %vm3272_vm8, %v586_v21, -1e+30  ;;  %v2548_v8 = vpop.f32.mrf.mxu1  ;;  %v3307_v26 = vsel %vm3289_vm12, %v728_v2, -1e+30  ;;  %v2566_v27 = vpop.f32.mrf.mxu0  ;;  %vm3395_vm5 = vcmp.eq.s32.totalorder %v1057_v40, 1 }
 0x1f6   :  { %2764 = vpow2.f32 %v1450_v5  ;;  %v1430_v29 = vmax.f32 %v1428_v18, %v1429_v4  ;;  %v1419_v12 = vsel %vm1383_vm7, %v3303_v6, -inf  ;;  %v1095_v34 = vsel %vm1094_vm10, %v3307_v26, -inf }
 0x1f7   :  { %2766 = vpow2.f32 %v1456_v23  ;;  %v1410_v30 = vrot.slane %v1409_v24, 1  ;;  %v1420_v32 = vrot.slane %v1419_v12, 4  ;;  %v589_v33 = vpop.f32.mrf.mxu1  ;;  %v731_v35 = vpop.f32.mrf.mxu0 }
 0x1f8   :  { %v1431_v37 = vrot.slane %v1430_v29, 1  ;;  %v3320_v39 = vsel %vm3289_vm12, %v731_v35, -1e+30 }
 0x1f9   :  { %v3324_v41 = vpop.eup %2760  ;;  %v1411_v43 = vmax.f32 %v1409_v24, %v1410_v30  ;;  %v1421_v44 = vmax.f32 %v1419_v12, %v1420_v32  ;;  %v2549_v46 = vpop.f32.mrf.mxu1  ;;  %v1096_v48 = vsel %vm1094_vm10, %v3320_v39, -inf  ;;  %v1065_v30 = vrot.slane %v3341_v60, %v3209_v25 }
 0x1fa   :  { %v2567_v49 = vpop.f32.mrf.mxu0  ;;  %v1478_v51 = vsel %vm1383_vm7, %v3324_v41, 0.0  ;;  %v1432_v52 = vmax.f32 %v1430_v29, %v1431_v37  ;;  %v1097_v53 = vmax.f32 %v1095_v34, %v1096_v48 }
 0x1fb   :  { %v3336_v54 = vpop.eup %2762  ;;  %v1479_v55 = vrot.slane %v1478_v51, 4  ;;  %v1443_v56 = vsub.f32 %v3261_v38, %v1411_v43  ;;  %v1422_v57 = vrot.slane %v1421_v44, 2  ;;  %v688_v58 = vpop.f32.mrf.mxu1  ;;  %v3373_v43 = vsel %vm1029_vm3, 1, %v2985_v7 }
 0x1fc   :  { %v810_v59 = vpop.f32.mrf.mxu0  ;;  %v1464_v61 = vsel %vm1383_vm7, %v3336_v54, 0.0  ;;  %v1446_v62 = vsub.f32 %v3265_v45, %v1432_v52  ;;  %v3348_v63 = vsel %vm3279_vm9, %v688_v58, -1e+30  ;;  %v1098_v0 = vrot.slane %v1097_v53, 4 }
 0x1fd   :  { %v1480_v1 = vadd.f32 %v1479_v55, %v1478_v51  ;;  %v1465_v10 = vrot.slane %v1464_v61, 4  ;;  %v1454_v38 = vmul.f32 1.442695, %v1443_v56  ;;  %v1423_v17 = vmax.f32 %v1421_v44, %v1422_v57  ;;  %v2560_v15 = vpop.f32.mrf.mxu1 }
 0x1fe   :  { %v2578_v18 = vpop.f32.mrf.mxu0  ;;  %v1460_v19 = vmul.f32 1.442695, %v1446_v62  ;;  %v1433_v20 = vsel %vm1383_vm7, %v3348_v63, -inf  ;;  %v1099_v21 = vmax.f32 %v1097_v53, %v1098_v0  ;;  %v3354_v2 = vsel %vm3294_vm13, %v810_v59, -1e+30 }
 0x1ff   :  { %v1481_v45 = vrot.slane %v1480_v1, 2  ;;  %v1466_v13 = vadd.f32 %v1465_v10, %v1464_v61  ;;  %2768 = vpow2.f32 %v1454_v38  ;;  %v1424_v22 = vrot.slane %v1423_v17, 1  ;;  %v691_v5 = vpop.f32.mrf.mxu1 }
 0x200   :  { %v813_v23 = vpop.f32.mrf.mxu0  ;;  %2770 = vpow2.f32 %v1460_v19  ;;  %v1434_v4 = vrot.slane %v1433_v20, 4  ;;  %v1100_v24 = vrot.slane %v1099_v21, 2  ;;  %v1113_v8 = vsel %vm1094_vm10, %v3354_v2, -inf }
 0x201   :  { %v1482_v27 = vadd.f32 %v1481_v45, %v1480_v1  ;;  %v1467_v28 = vrot.slane %v1466_v13, 2  ;;  %v1425_v29 = vmax.f32 %v1423_v17, %v1424_v22  ;;  %v2561_v12 = vpop.f32.mrf.mxu1  ;;  %v3367_v32 = vsel %vm3294_vm13, %v813_v23, -1e+30 }
 0x202   :  { %v2579_v33 = vpop.f32.mrf.mxu0  ;;  %v1435_v34 = vmax.f32 %v1433_v20, %v1434_v4  ;;  %v1101_v35 = vmax.f32 %v1099_v21, %v1100_v24  ;;  %v1114_v37 = vsel %vm1094_vm10, %v3367_v32, -inf  ;;  %vm3468_vm8 = vcmp.eq.s32.totalorder %v1065_v30, 1 }
 0x203   :  { %v3375_v44 = vpop.eup %2764  ;;  %v1483_v14 = vrot.slane %v1482_v27, 1  ;;  %v1468_v11 = vadd.f32 %v1467_v28, %v1466_v13  ;;  %v1445_v46 = vsub.f32 %v3303_v6, %v1425_v29  ;;  %v769_v48 = vpop.f32.mrf.mxu1  ;;  %v1115_v3 = vmax.f32 %v1113_v8, %v1114_v37 }
 0x204   :  { %v3378_v49 = vpop.f32.mrf.mxu0  ;;  %v3380_v51 = vpop.eup %2766  ;;  %v1471_v52 = vsel %vm1383_vm7, %v3375_v44, 0.0  ;;  %v1436_v53 = vrot.slane %v1435_v34, 2  ;;  %v3386_v7 = vsel %vm3326_vm2, %v769_v48, -1e+30  ;;  %v1102_v36 = vrot.slane %v1101_v35, 1 }
 0x205   :  { %v1484_v55 = vadd.f32 %v1483_v14, %v1482_v27  ;;  %v1469_v56 = vrot.slane %v1468_v11, 1  ;;  %v1472_v57 = vrot.slane %v1471_v52, 4  ;;  %v1492_v6 = vsel %vm1383_vm7, %v3380_v51, 0.0  ;;  %v2572_v58 = vpop.f32.mrf.mxu1 }
 0x206   :  { %v2590_v59 = vpop.f32.mrf.mxu0  ;;  %v1493_v61 = vrot.slane %v1492_v6, 4  ;;  %v1458_v62 = vmul.f32 1.442695, %v1445_v46  ;;  %v1437_v0 = vmax.f32 %v1435_v34, %v1436_v53  ;;  %v1104_v1 = vsel %vm1094_vm10, %v3386_v7, -inf }
 0x207   :  { %2772 = vrcp.f32 %v1484_v55  ;;  %v1470_v10 = vadd.f32 %v1469_v56, %v1468_v11  ;;  %v1473_v38 = vadd.f32 %v1472_v57, %v1471_v52  ;;  %v1103_v17 = vmax.f32 %v1101_v35, %v1102_v36  ;;  %v772_v15 = vpop.f32.mrf.mxu1 }
 0x208   :  { %v3399_v19 = vpop.f32.mrf.mxu0  ;;  %v1494_v20 = vadd.f32 %v1493_v61, %v1492_v6  ;;  %2774 = vpow2.f32 %v1458_v62  ;;  %v1438_v21 = vrot.slane %v1437_v0, 1  ;;  %v3403_v45 = vsel %vm3326_vm2, %v772_v15, -1e+30 }
 0x209   :  { %2776 = vrcp.f32 %v1470_v10  ;;  %v1474_v13 = vrot.slane %v1473_v38, 2  ;;  %v1167_v22 = vsub.f32 %v3307_v26, %v1103_v17  ;;  %v1168_v5 = vsub.f32 %v3320_v39, %v1103_v17  ;;  %v2573_v9 = vpop.f32.mrf.mxu1 }
 0x20a   :  { %v2591_v40 = vpop.f32.mrf.mxu0  ;;  %v1495_v23 = vrot.slane %v1494_v20, 2  ;;  %v1439_v4 = vmax.f32 %v1437_v0, %v1438_v21  ;;  %v1105_v24 = vsel %vm1094_vm10, %v3403_v45, -inf  ;;  %v1116_v8 = vrot.slane %v1115_v3, 4 }
 0x20b   :  { %v1475_v27 = vadd.f32 %v1474_v13, %v1473_v38  ;;  %v1183_v28 = vmul.f32 1.442695, %v1167_v22  ;;  %v1185_v29 = vmul.f32 1.442695, %v1168_v5  ;;  %v1106_v47 = vmax.f32 %v1104_v1, %v1105_v24  ;;  %v851_v12 = vpop.f32.mrf.mxu1 }
 0x20c   :  { %v3416_v39 = vpop.f32.mrf.mxu0  ;;  %v3418_v33 = vpop.eup %2768  ;;  %v1496_v34 = vadd.f32 %v1495_v23, %v1494_v20  ;;  %v1447_v35 = vsub.f32 %v3348_v63, %v1439_v4  ;;  %v3423_v37 = vsel %vm3361_vm4, %v851_v12, -1e+30  ;;  %v1117_v14 = vmax.f32 %v1115_v3, %v1116_v8 }
 0x20d   :  { %v3425_v11 = vpop.eup %2770  ;;  %v1476_v46 = vrot.slane %v1475_v27, 1  ;;  %v1485_v31 = vsel %vm1383_vm7, %v3418_v33, 0.0  ;;  %2778 = vpow2.f32 %v1183_v28  ;;  %v1107_v50 = vrot.slane %v1106_v47, 4  ;;  %v2584_v48 = vpop.f32.mrf.mxu1 }
 0x20e   :  { %v2602_v52 = vpop.f32.mrf.mxu0  ;;  %v1497_v53 = vrot.slane %v1496_v34, 1  ;;  %v1486_v36 = vrot.slane %v1485_v31, 4  ;;  %v1506_v63 = vsel %vm1383_vm7, %v3425_v11, 0.0  ;;  %v1462_v55 = vmul.f32 1.442695, %v1447_v35 }
 0x20f   :  { %v1477_v56 = vadd.f32 %v1476_v46, %v1475_v27  ;;  %v1507_v57 = vrot.slane %v1506_v63, 4  ;;  %2780 = vpow2.f32 %v1185_v29  ;;  %v1108_v3 = vmax.f32 %v1106_v47, %v1107_v50  ;;  %v854_v6 = vpop.f32.mrf.mxu1 }
 0x210   :  { %v3431_v58 = vpop.f32.mrf.mxu0  ;;  %v1498_v59 = vadd.f32 %v1497_v53, %v1496_v34  ;;  %v1487_v61 = vadd.f32 %v1486_v36, %v1485_v31  ;;  %2782 = vpow2.f32 %v1462_v55  ;;  %v1122_v62 = vsel %vm1094_vm10, %v3423_v37, -inf }
 0x211   :  { %2784 = vrcp.f32 %v1477_v56  ;;  %v1508_v0 = vadd.f32 %v1507_v57, %v1506_v63  ;;  %v1109_v1 = vrot.slane %v1108_v3, 2  ;;  %v1118_v10 = vrot.slane %v1117_v14, 2  ;;  %v2585_v38 = vpop.f32.mrf.mxu1 }
 0x212   :  { %v2603_v17 = vpop.f32.mrf.mxu0  ;;  %2786 = vrcp.f32 %v1498_v59  ;;  %v1488_v15 = vrot.slane %v1487_v61, 2  ;;  %v3437_v20 = vsel %vm3361_vm4, %v854_v6, -1e+30  ;;  %v3442_v21 = vsel %vm3395_vm5, %v3378_v49, -1e+30 }
 0x213   :  { %v1509_v13 = vrot.slane %v1508_v0, 2  ;;  %v1110_v22 = vmax.f32 %v1108_v3, %v1109_v1  ;;  %v1119_v5 = vmax.f32 %v1117_v14, %v1118_v10  ;;  %v1123_v9 = vsel %vm1094_vm10, %v3437_v20, -inf  ;;  %v933_v40 = vpop.f32.mrf.mxu1 }
 0x214   :  { %v2773_v23 = vpop.eup %2772  ;;  %v1489_v4 = vadd.f32 %v1488_v15, %v1487_v61  ;;  %v1124_v24 = vmax.f32 %v1122_v62, %v1123_v9  ;;  %v1069_v8 = vrot.slane %v3373_v43, %v3209_v25  ;;  %v3454_v47 = vsel %vm1094_vm10, %v3442_v21, -inf }
 0x215   :  { %v3450_v27 = vpop.eup %2774  ;;  %v1510_v49 = vadd.f32 %v1509_v13, %v1508_v0  ;;  %v1111_v28 = vrot.slane %v1110_v22, 1  ;;  %v1120_v29 = vrot.slane %v1119_v5, 1  ;;  %v2596_v12 = vpop.f32.mrf.mxu1  ;;  %v3460_v60 = vsel %vm3412_vm6, %v933_v40, -1e+30 }
 0x216   :  { %v2777_v34 = vpop.eup %2776  ;;  %v1490_v35 = vrot.slane %v1489_v4, 1  ;;  %v1499_v14 = vsel %vm1383_vm7, %v3450_v27, 0.0  ;;  %v1125_v46 = vrot.slane %v1124_v24, 4  ;;  %v3464_v50 = vmul.f32 %v2773_v23, %v3324_v41 }
 0x217   :  { %v1511_v25 = vrot.slane %v1510_v49, 1  ;;  %v1500_v43 = vrot.slane %v1499_v14, 4  ;;  %v1521_v31 = vmul.f32 %v2777_v34, %v3336_v54  ;;  %v3466_v48 = vpop.f32.mrf.mxu1  ;;  %v1112_v53 = vmax.f32 %v1110_v22, %v1111_v28 }
 0x218   :  { %v1491_v52 = vadd.f32 %v1490_v35, %v1489_v4  ;;  %v1121_v36 = vmax.f32 %v1119_v5, %v1120_v29  ;;  %v1126_v63 = vmax.f32 %v1124_v24, %v1125_v46  ;;  %v3475_v54 = vsel %vm3395_vm5, %v3399_v19, -1e+30 }
 0x219   :  { %v1512_v56 = vadd.f32 %v1511_v25, %v1510_v49  ;;  %v1501_v57 = vadd.f32 %v1500_v43, %v1499_v14  ;;  %v1536_v3 = vpack.c.bf16 %v1521_v31, %v1521_v31  ;;  %v2597_v41 = vpop.f32.mrf.mxu1  ;;  %v1169_v59 = vsub.f32 %v3386_v7, %v1112_v53  ;;  %v2840_v7 = vld [vmem:[#allocation5 + $0x10] sm:$0xff]  }
 0x21a   :  { %v3477_v6 = vpop.eup %2778  ;;  %2788 = vrcp.f32 %v1491_v52  ;;  %v1170_v61 = vsub.f32 %v3403_v45, %v1112_v53  ;;  %v1171_v62 = vsub.f32 %v3354_v2, %v1121_v36  ;;  %vm3482_vm9 = vcmp.eq.s32.totalorder %v1069_v8, 1 }
 0x21b   :  { %2790 = vrcp.f32 %v1512_v56  ;;  %v1502_v1 = vrot.slane %v1501_v57, 2  ;;  %2613 = vmatmul.mubr.msk.bf16.vlgmr.msra.gmra.mxu0 %vm1383_vm7, %v1536_v3  ;;  %v1215_v18 = vsel %vm1094_vm10, %v3477_v6, 0.0  ;;  %v1172_v19 = vsub.f32 %v3367_v32, %v1121_v36  ;;  %v1015_v10 = vpop.f32.mrf.mxu1  ;;  %v2841_v56 = vld [vmem:[#allocation5 + $0x20] sm:$0xff]  }
 0x21c   :  { %v3490_v38 = vpop.eup %2780  ;;  %2623 = vmatpush3.bf16.msra.mxu0 %v2840_v7  ;;  %2624 = vmatprep.mubr.msk.bf16.mxu0 %vm2983_vm1, %v2982_v16  ;;  %v1538_v2 = vpack.c.bf16 %v3464_v50, %v3464_v50  ;;  %v1187_v45 = vmul.f32 1.442695, %v1169_v59  ;;  %v1189_v17 = vmul.f32 1.442695, %v1170_v61  ;;  %v1191_v15 = vmul.f32 1.442695, %v1171_v62 }
 0x21d   :  { %v3496_v13 = vpop.eup %2782  ;;  %v1503_v22 = vadd.f32 %v1502_v1, %v1501_v57  ;;  %2634 = vmatprep.subr.bf16.mxu0 %v2982_v16  ;;  %v1216_v32 = vsel %vm1094_vm10, %v3490_v38, 0.0  ;;  %v1193_v5 = vmul.f32 1.442695, %v1172_v19  ;;  %v1127_v9 = vrot.slane %v1126_v63, 2  ;;  %v2608_v40 = vpop.f32.mrf.mxu1 }
 0x21e   :  { %v2785_v23 = vpop.eup %2784  ;;  %v1513_v4 = vsel %vm1383_vm7, %v3496_v13, 0.0  ;;  %v1217_v24 = vadd.f32 %v1216_v32, %v1215_v18  ;;  %2792 = vpow2.f32 %v1187_v45  ;;  %v1132_v30 = vsel %vm1094_vm10, %v3475_v54, -inf }
 0x21f   :  { %v2787_v8 = vpop.eup %2786  ;;  %v1504_v49 = vrot.slane %v1503_v22, 1  ;;  %v1514_v28 = vrot.slane %v1513_v4, 4  ;;  %v1523_v29 = vmul.f32 %v2785_v23, %v3375_v44  ;;  %2794 = vpow2.f32 %v1189_v17  ;;  %v3506_v12 = vpop.f32.mrf.mxu1 }
 0x220   :  { %v1529_v34 = vmul.f32 %v2787_v8, %v3380_v51  ;;  %v1218_v35 = vrot.slane %v1217_v24, 4  ;;  %2796 = vpow2.f32 %v1191_v15  ;;  %v1128_v14 = vmax.f32 %v1126_v63, %v1127_v9  ;;  %v2842_v8 = vld [vmem:[#allocation5 + $0x30] sm:$0xff]  }
 0x221   :  { %v1505_v46 = vadd.f32 %v1504_v49, %v1503_v22  ;;  %v1515_v25 = vadd.f32 %v1514_v28, %v1513_v4  ;;  %v1537_v43 = vpack.c.bf16 %v1523_v29, %v1523_v29  ;;  %2798 = vpow2.f32 %v1193_v5  ;;  %v2609_v31 = vpop.f32.mrf.mxu1 }
 0x222   :  { %v1219_v50 = vadd.f32 %v1218_v35, %v1217_v24  ;;  %v1129_v52 = vrot.slane %v1128_v14, 1  ;;  %v1140_v53 = vsel %vm1094_vm10, %v3460_v60, -inf  ;;  %v1133_v44 = vmax.f32 %v3454_v47, %v1132_v30 }
 0x223   :  { %2800 = vrcp.f32 %v1505_v46  ;;  %v1516_v36 = vrot.slane %v1515_v25, 2  ;;  %2619 = vmatmul.mubr.msk.bf16.vlgmr.msra.gmra.mxu1 %vm1383_vm7, %v1537_v43  ;;  %2625 = vmatmul.mubr.msk.bf16.vlgmr.msra.gmra.mxu0 %vm1383_vm7, %v1538_v2  ;;  %v3517_v51 = vsel %vm3412_vm6, %v3466_v48, -1e+30  ;;  %v3522_v63 = vsel %vm3468_vm8, %v3416_v39, -1e+30 }
 0x224   :  { %2629 = vmatpush3.bf16.msra.mxu1 %v3110_v42  ;;  %2635 = vmatpush3.bf16.msra.mxu0 %v2841_v56  ;;  %v1220_v47 = vrot.slane %v1219_v50, 2  ;;  %v1130_v57 = vmax.f32 %v1128_v14, %v1129_v52  ;;  %v1134_v3 = vrot.slane %v1133_v44, 4  ;;  %v1141_v41 = vsel %vm1094_vm10, %v3517_v51, -inf }
 0x225   :  { %v1517_v59 = vadd.f32 %v1516_v36, %v1515_v25  ;;  %2630 = vmatprep.mubr.msk.bf16.mxu1 %vm2983_vm1, %v2982_v16  ;;  %2636 = vmatprep.mubr.msk.bf16.mxu0 %vm2983_vm1, %v2982_v16  ;;  %v1540_v26 = vpack.c.bf16 %v1529_v34, %v1529_v34  ;;  %v1142_v39 = vmax.f32 %v1140_v53, %v1141_v41  ;;  %v3533_v42 = vsel %vm3482_vm9, %v1015_v10, -1e+30 }
 0x226   :  { %2640 = vmatprep.subr.bf16.mxu1 %v2982_v16  ;;  %2646 = vmatprep.subr.bf16.mxu0 %v2982_v16  ;;  %v1221_v48 = vadd.f32 %v1220_v47, %v1219_v50  ;;  %v1173_v61 = vsub.f32 %v3423_v37, %v1130_v57  ;;  %v1174_v62 = vsub.f32 %v3437_v20, %v1130_v57  ;;  %v1149_v1 = vsel %vm1094_vm10, %v3522_v63, -inf }
 0x227   :  { %v2789_v18 = vpop.eup %2788  ;;  %v1518_v19 = vrot.slane %v1517_v59, 1  ;;  %v1135_v7 = vmax.f32 %v1133_v44, %v1134_v3  ;;  %v1143_v2 = vrot.slane %v1142_v39, 4  ;;  %v3544_v10 = vsel %vm3468_vm8, %v3431_v58, -1e+30 }
 0x228   :  { %v2791_v45 = vpop.eup %2790  ;;  %v1527_v17 = vmul.f32 %v2789_v18, %v3418_v33  ;;  %v1222_v15 = vrot.slane %v1221_v48, 1  ;;  %v1195_v22 = vmul.f32 1.442695, %v1173_v61  ;;  %v1158_v37 = vsel %vm1094_vm10, %v3533_v42, -inf }
 0x229   :  { %v1519_v20 = vadd.f32 %v1518_v19, %v1517_v59  ;;  %v1197_v32 = vmul.f32 1.442695, %v1174_v62  ;;  %v1136_v5 = vrot.slane %v1135_v7, 2  ;;  %v1144_v9 = vmax.f32 %v1142_v39, %v1143_v2 }
 0x22a   :  { %v1539_v40 = vpack.c.bf16 %v1527_v17, %v1527_v17  ;;  %v1223_v23 = vadd.f32 %v1222_v15, %v1221_v48  ;;  %2802 = vpow2.f32 %v1195_v22  ;;  %v1150_v55 = vsel %vm1094_vm10, %v3544_v10, -inf  ;;  %v2844_v22 = vld [vmem:[#allocation5 + $0x38] sm:$0xff]  }
 0x22b   :  { %v3551_v58 = vpop.eup %2792  ;;  %2804 = vrcp.f32 %v1519_v20  ;;  %2637 = vmatmul.mubr.msk.bf16.vlgmr.msra.gmra.mxu0 %vm1383_vm7, %v1540_v26  ;;  %v1533_v33 = vmul.f32 %v2791_v45, %v3425_v11  ;;  %v1137_v4 = vmax.f32 %v1135_v7, %v1136_v5  ;;  %v1145_v24 = vrot.slane %v1144_v9, 2  ;;  %v2843_v11 = vld [vmem:[#allocation5 + $0x28] sm:$0xff]  }
 0x22c   :  { %v3555_v30 = vpop.eup %2794  ;;  %2631 = vmatmul.mubr.msk.bf16.vlgmr.msra.gmra.mxu1 %vm1383_vm7, %v1539_v40  ;;  %2647 = vmatpush3.bf16.msra.mxu0 %v2842_v8  ;;  %2806 = vrcp.f32 %v1223_v23  ;;  %v1224_v49 = vsel %vm1094_vm10, %v3551_v58, 0.0  ;;  %v1151_v28 = vmax.f32 %v1149_v1, %v1150_v55  ;;  %v3563_v29 = vsel %vm3482_vm9, %v3506_v12, -1e+30 }
 0x22d   :  { %v3565_v34 = vpop.eup %2796  ;;  %2641 = vmatpush3.bf16.msra.mxu1 %v2843_v11  ;;  %2642 = vmatprep.mubr.msk.bf16.mxu1 %vm2983_vm1, %v2982_v16  ;;  %v1225_v35 = vsel %vm1094_vm10, %v3555_v30, 0.0  ;;  %2808 = vpow2.f32 %v1197_v32  ;;  %v1138_v14 = vrot.slane %v1137_v4, 1  ;;  %v1146_v46 = vmax.f32 %v1144_v9, %v1145_v24 }
 0x22e   :  { %v3571_v25 = vpop.eup %2798  ;;  %2648 = vmatprep.mubr.msk.bf16.mxu0 %vm2983_vm1, %v2982_v16  ;;  %2652 = vmatprep.subr.bf16.mxu1 %v2982_v16  ;;  %v1226_v0 = vadd.f32 %v1225_v35, %v1224_v49  ;;  %v1233_v12 = vsel %vm1094_vm10, %v3565_v34, 0.0  ;;  %v1152_v43 = vrot.slane %v1151_v28, 4  ;;  %v1159_v31 = vsel %vm1094_vm10, %v3563_v29, -inf }
 0x22f   :  { %v1234_v50 = vsel %vm1094_vm10, %v3571_v25, 0.0  ;;  %v1139_v52 = vmax.f32 %v1137_v4, %v1138_v14  ;;  %v1147_v53 = vrot.slane %v1146_v46, 1  ;;  %v1160_v44 = vmax.f32 %v1158_v37, %v1159_v31  ;;  %2658 = vmatprep.subr.bf16.mxu0 %v2982_v16 }
 0x230   :  { %v2801_v36 = vpop.eup %2800  ;;  %v1542_v56 = vpack.c.bf16 %v1533_v33, %v1533_v33  ;;  %v1227_v47 = vrot.slane %v1226_v0, 4  ;;  %v1235_v57 = vadd.f32 %v1234_v50, %v1233_v12  ;;  %v1153_v3 = vmax.f32 %v1151_v28, %v1152_v43 }
 0x231   :  { %v1531_v41 = vmul.f32 %v2801_v36, %v3450_v27  ;;  %v1175_v59 = vsub.f32 %v3442_v21, %v1139_v52  ;;  %v1176_v26 = vsub.f32 %v3475_v54, %v1139_v52  ;;  %v1148_v39 = vmax.f32 %v1146_v46, %v1147_v53 }
 0x232   :  { %v1228_v48 = vadd.f32 %v1227_v47, %v1226_v0  ;;  %v1236_v61 = vrot.slane %v1235_v57, 4  ;;  %v1154_v62 = vrot.slane %v1153_v3, 2  ;;  %v1161_v1 = vrot.slane %v1160_v44, 4 }
 0x233   :  { %v1541_v18 = vpack.c.bf16 %v1531_v41, %v1531_v41  ;;  %2649 = vmatmul.mubr.msk.bf16.vlgmr.msra.gmra.mxu0 %vm1383_vm7, %v1542_v56  ;;  %v1199_v19 = vmul.f32 1.442695, %v1175_v59  ;;  %v1201_v7 = vmul.f32 1.442695, %v1176_v26  ;;  %v1177_v2 = vsub.f32 %v3460_v60, %v1148_v39 }
 0x234   :  { %v1229_v45 = vrot.slane %v1228_v48, 2  ;;  %v1237_v17 = vadd.f32 %v1236_v61, %v1235_v57  ;;  %v1178_v27 = vsub.f32 %v3517_v51, %v1148_v39  ;;  %v1155_v15 = vmax.f32 %v1153_v3, %v1154_v62  ;;  %2660 = vmatprep.mubr.msk.bf16.mxu0 %vm2983_vm1, %v2982_v16 }
 0x235   :  { %2643 = vmatmul.mubr.msk.bf16.vlgmr.msra.gmra.mxu1 %vm1383_vm7, %v1541_v18  ;;  %2810 = vpow2.f32 %v1199_v19  ;;  %v1203_v21 = vmul.f32 1.442695, %v1177_v2  ;;  %v1162_v54 = vmax.f32 %v1160_v44, %v1161_v1 }
 0x236   :  { %2653 = vmatpush3.bf16.msra.mxu1 %v2844_v22  ;;  %2654 = vmatprep.mubr.msk.bf16.mxu1 %vm2983_vm1, %v2982_v16  ;;  %v1230_v37 = vadd.f32 %v1229_v45, %v1228_v48  ;;  %v1238_v60 = vrot.slane %v1237_v17, 2  ;;  %2812 = vpow2.f32 %v1201_v7  ;;  %v1205_v20 = vmul.f32 1.442695, %v1178_v27 }
 0x237   :  { %v3594_v32 = vpop.eup %2802  ;;  %2814 = vpow2.f32 %v1203_v21  ;;  %v1156_v51 = vrot.slane %v1155_v15, 1  ;;  %v1163_v5 = vrot.slane %v1162_v54, 2  ;;  %2664 = vmatprep.subr.bf16.mxu1 %v2982_v16 }
 0x238   :  { %v2805_v9 = vpop.eup %2804  ;;  %v1231_v40 = vrot.slane %v1230_v37, 1  ;;  %v1239_v23 = vadd.f32 %v1238_v60, %v1237_v17  ;;  %2816 = vpow2.f32 %v1205_v20  ;;  %v1242_v4 = vsel %vm1094_vm10, %v3594_v32, 0.0 }
 0x239   :  { %v2807_v55 = vpop.eup %2806  ;;  %v1535_v33 = vmul.f32 %v2805_v9, %v3496_v13  ;;  %v1157_v24 = vmax.f32 %v1155_v15, %v1156_v51  ;;  %v1164_v8 = vmax.f32 %v1162_v54, %v1163_v5 }
 0x23a   :  { %v3600_v49 = vpop.eup %2808  ;;  %v1232_v28 = vadd.f32 %v1231_v40, %v1230_v37  ;;  %v1240_v11 = vrot.slane %v1239_v23, 1  ;;  %v3603_v35 = vmul.f32 %v2807_v55, %v3477_v6  ;;  %v3606_v14 = vmul.f32 %v2807_v55, %v3490_v38 }
 0x23b   :  { %v1543_v46 = vpack.c.bf16 %v1535_v33, %v1535_v33  ;;  %v1243_v0 = vsel %vm1094_vm10, %v3600_v49, 0.0  ;;  %v1179_v13 = vsub.f32 %v3522_v63, %v1157_v24  ;;  %v1180_v12 = vsub.f32 %v3544_v10, %v1157_v24 }
 0x23c   :  { %2818 = vrcp.f32 %v1232_v28  ;;  %v1241_v43 = vadd.f32 %v1240_v11, %v1239_v23  ;;  %v1244_v31 = vadd.f32 %v1243_v0, %v1242_v4  ;;  %v1165_v50 = vrot.slane %v1164_v8, 1 }
 0x23d   :  { %2655 = vmatmul.mubr.msk.bf16.vlgmr.msra.gmra.mxu1 %vm1383_vm7, %v1543_v46  ;;  %v1207_v52 = vmul.f32 1.442695, %v1179_v13  ;;  %v1209_v6 = vmul.f32 1.442695, %v1180_v12  ;;  %v1311_v38 = vpack.c.bf16 %v3606_v14, %v3603_v35  ;;  %vm1955_vm7 = vcmask 1043456  }
 0x23e   :  { %2820 = vrcp.f32 %v1241_v43  ;;  %v1245_v53 = vrot.slane %v1244_v31, 4  ;;  %v1166_v44 = vmax.f32 %v1164_v8, %v1165_v50  ;;  %2666 = vmatprep.mubr.msk.bf16.mxu1 %vm2983_vm1, %v2982_v16 }
 0x23f   :  { %2822 = vpow2.f32 %v1207_v52 }
 0x240   :  { %v1246_v63 = vadd.f32 %v1245_v53, %v1244_v31  ;;  %2824 = vpow2.f32 %v1209_v6  ;;  %v1181_v10 = vsub.f32 %v3533_v42, %v1166_v44  ;;  %v1182_v36 = vsub.f32 %v3563_v29, %v1166_v44 }
 0x242   :  { %v3619_v56 = vpop.eup %2810  ;;  %v1247_v47 = vrot.slane %v1246_v63, 2  ;;  %v1211_v57 = vmul.f32 1.442695, %v1181_v10  ;;  %v1213_v3 = vmul.f32 1.442695, %v1182_v36 }
 0x243   :  { %v3621_v41 = vpop.eup %2812  ;;  %v1251_v59 = vsel %vm1094_vm10, %v3619_v56, 0.0 }
 0x244   :  { %v3625_v26 = vpop.eup %2814  ;;  %v1248_v39 = vadd.f32 %v1247_v47, %v1246_v63  ;;  %v1252_v48 = vsel %vm1094_vm10, %v3621_v41, 0.0  ;;  %2826 = vpow2.f32 %v1211_v57 }
 0x245   :  { %v3629_v42 = vpop.eup %2816  ;;  %v1253_v29 = vadd.f32 %v1252_v48, %v1251_v59  ;;  %v1260_v61 = vsel %vm1094_vm10, %v3625_v26, 0.0  ;;  %2828 = vpow2.f32 %v1213_v3 }
 0x246   :  { %v1249_v62 = vrot.slane %v1248_v39, 1  ;;  %v1261_v1 = vsel %vm1094_vm10, %v3629_v42, 0.0 }
 0x247   :  { %v1254_v18 = vrot.slane %v1253_v29, 4  ;;  %v1262_v19 = vadd.f32 %v1261_v1, %v1260_v61 }
 0x248   :  { %v1250_v7 = vadd.f32 %v1249_v62, %v1248_v39 }
 0x249   :  { %v2819_v2 = vpop.eup %2818  ;;  %v1255_v45 = vadd.f32 %v1254_v18, %v1253_v29  ;;  %v1263_v17 = vrot.slane %v1262_v19, 4 }
 0x24a   :  { %2830 = vrcp.f32 %v1250_v7  ;;  %v3636_v27 = vmul.f32 %v2819_v2, %v3551_v58  ;;  %v3639_v15 = vmul.f32 %v2819_v2, %v3555_v30 }
 0x24b   :  { %v2821_v21 = vpop.eup %2820  ;;  %v1256_v54 = vrot.slane %v1255_v45, 2  ;;  %v1264_v22 = vadd.f32 %v1263_v17, %v1262_v19  ;;  %v1913_v17 = vpop.permute.xlu0 %1912 }
 0x24c   :  { %v2823_v37 = vpop.eup %2822  ;;  %v1312_v60 = vpack.c.bf16 %v3639_v15, %v3636_v27  ;;  %v3644_v20 = vmul.f32 %v2821_v21, %v3565_v34  ;;  %v3647_v51 = vmul.f32 %v2821_v21, %v3571_v25 }
 0x24d   :  { %v2825_v5 = vpop.eup %2824  ;;  %v1257_v9 = vadd.f32 %v1256_v54, %v1255_v45  ;;  %v1265_v58 = vrot.slane %v1264_v22, 2  ;;  %v1269_v40 = vsel %vm1094_vm10, %v2823_v37, 0.0 }
 0x24e   :  { %v1270_v30 = vsel %vm1094_vm10, %v2825_v5, 0.0  ;;  %v1313_v23 = vpack.c.bf16 %v3647_v51, %v3644_v20 }
 0x24f   :  { %v1258_v55 = vrot.slane %v1257_v9, 1  ;;  %v1266_v33 = vadd.f32 %v1265_v58, %v1264_v22  ;;  %v1271_v4 = vadd.f32 %v1270_v30, %v1269_v40  ;;  %v1917_v58 = vpop.permute.xlu1 %1916  ;;  %v1915_v40 = vpop.permute.xlu0 %1914 }
 0x251   :  { %v2827_v24 = vpop.eup %2826  ;;  %v1259_v8 = vadd.f32 %v1258_v55, %v1257_v9  ;;  %v1267_v34 = vrot.slane %v1266_v33, 1  ;;  %v1272_v28 = vrot.slane %v1271_v4, 4 }
 0x252   :  { %v2829_v11 = vpop.eup %2828  ;;  %v1278_v25 = vsel %vm1094_vm10, %v2827_v24, 0.0 }
 0x253   :  { %2832 = vrcp.f32 %v1259_v8  ;;  %v1268_v46 = vadd.f32 %v1267_v34, %v1266_v33  ;;  %v1273_v0 = vadd.f32 %v1272_v28, %v1271_v4  ;;  %v1279_v13 = vsel %vm1094_vm10, %v2829_v11, 0.0 }
 0x254   :  { %v1280_v12 = vadd.f32 %v1279_v13, %v1278_v25  ;;  %v1921_v13 = vpop.permute.xlu0 %1920 }
 0x255   :  { %2834 = vrcp.f32 %v1268_v46  ;;  %v1274_v43 = vrot.slane %v1273_v0, 2 }
 0x256   :  { %v1281_v31 = vrot.slane %v1280_v12, 4 }
 0x257   :  { %v2831_v50 = vpop.eup %2830  ;;  %v1275_v52 = vadd.f32 %v1274_v43, %v1273_v0 }
 0x258   :  { %v1282_v6 = vadd.f32 %v1281_v31, %v1280_v12  ;;  %v3656_v53 = vmul.f32 %v2831_v50, %v3594_v32  ;;  %v3659_v44 = vmul.f32 %v2831_v50, %v3600_v49  ;;  %v1919_v31 = vpop.permute.xlu1 %1918 }
 0x259   :  { %v1276_v63 = vrot.slane %v1275_v52, 1 }
 0x25a   :  { %v1283_v10 = vrot.slane %v1282_v6, 2  ;;  %v1314_v36 = vpack.c.bf16 %v3659_v44, %v3656_v53 }
 0x25b   :  { %v1277_v47 = vadd.f32 %v1276_v63, %v1275_v52 }
 0x25c   :  { %v1284_v57 = vadd.f32 %v1283_v10, %v1282_v6 }
 0x25d   :  { %2836 = vrcp.f32 %v1277_v47 }
 0x25e   :  { %v1285_v3 = vrot.slane %v1284_v57, 1 }
 0x260   :  { %v2833_v59 = vpop.eup %2832  ;;  %v1286_v39 = vadd.f32 %v1285_v3, %v1284_v57  ;;  %v1925_v57 = vpop.permute.xlu0 %1924 }
 0x261   :  { %v3664_v48 = vmul.f32 %v2833_v59, %v3619_v56  ;;  %v3667_v32 = vmul.f32 %v2833_v59, %v3621_v41  ;;  %v1923_v59 = vpop.permute.xlu1 %1922 }
 0x262   :  { %v2835_v29 = vpop.eup %2834  ;;  %2838 = vrcp.f32 %v1286_v39 }
 0x263   :  { %v1315_v49 = vpack.c.bf16 %v3667_v32, %v3664_v48  ;;  %v3672_v61 = vmul.f32 %v2835_v29, %v3625_v26  ;;  %v3675_v62 = vmul.f32 %v2835_v29, %v3629_v42 }
 0x265   :  { %v1316_v1 = vpack.c.bf16 %v3675_v62, %v3672_v61 }
 0x26a   :  { %v2837_v18 = vpop.eup %2836 }
 0x26b   :  { %v3679_v56 = vmul.f32 %v2837_v18, %v2823_v37  ;;  %v3681_v19 = vmul.f32 %v2837_v18, %v2825_v5 }
 0x26d   :  { %v1317_v41 = vpack.c.bf16 %v3681_v19, %v3679_v56 }
 0x26f   :  { %v2839_v7 = vpop.eup %2838 }
 0x270   :  { %v3685_v2 = vmul.f32 %v2839_v7, %v2827_v24  ;;  %v3687_v45 = vmul.f32 %v2839_v7, %v2829_v11 }
 0x272   :  { %v1318_v26 = vpack.c.bf16 %v3687_v45, %v3685_v2 }
 0x2db   :  { %v1582_v42 = vpop.f32.mrf.mxu0 }
 0x2dc   :  { %v1896_v21 = vpack.c.bf16 %v1582_v42, %v1582_v42 }
 0x2dd   :  { %v2614_v54 = vpop.f32.mrf.mxu0 }
 0x2de   :  { %v1930_v22 = vsel %vm176_vm0, %v1896_v21, %v1913_v17  ;;  %v1927_v54 = vpop.permute.xlu1 %1926 }
 0x2df   :  { %v1956_v37 = vsel %vm1955_vm7, %v1930_v22, 0  ;;  %v1585_v5 = vpop.f32.mrf.mxu0 }
 0x2e0   :  { %2659 = vmatpush3.bf16.msra.mxu0 %v1956_v37 }
 0x2e1   :  { %v2615_v9 = vpop.f32.mrf.mxu0  ;;  %2670 = vmatprep.subr.bf16.mxu0 %v2982_v16 }
 0x2e3   :  { %v1626_v30 = vpop.f32.mrf.mxu1  ;;  %v1670_v55 = vpop.f32.mrf.mxu0  ;;  %2661 = vmatmul.mubr.msk.bf16.vlgmr.msra.gmra.mxu0 %vm1094_vm10, %v1311_v38 }
 0x2e4   :  { %v1897_v33 = vpack.c.bf16 %v1626_v30, %v1626_v30  ;;  %v1898_v4 = vpack.c.bf16 %v1670_v55, %v1670_v55  ;;  %2672 = vmatprep.mubr.msk.bf16.mxu0 %vm2983_vm1, %v2982_v16 }
 0x2e5   :  { %v2620_v24 = vpop.f32.mrf.mxu1  ;;  %v2626_v8 = vpop.f32.mrf.mxu0 }
 0x2e6   :  { %v1936_v34 = vsel %vm176_vm0, %v1898_v4, %v1917_v58  ;;  %v1933_v28 = vsel %vm176_vm0, %v1897_v33, %v1915_v40 }
 0x2e7   :  { %v2048_v11 = vsel %vm1955_vm7, %v1936_v34, 0  ;;  %v2002_v25 = vsel %vm1955_vm7, %v1933_v28, 0  ;;  %v1629_v46 = vpop.f32.mrf.mxu1  ;;  %v1673_v0 = vpop.f32.mrf.mxu0 }
 0x2e8   :  { %2665 = vmatpush3.bf16.msra.mxu1 %v2002_v25  ;;  %2671 = vmatpush3.bf16.msra.mxu0 %v2048_v11 }
 0x2e9   :  { %v2621_v35 = vpop.f32.mrf.mxu1  ;;  %v2627_v14 = vpop.f32.mrf.mxu0  ;;  %2676 = vmatprep.subr.bf16.mxu1 %v2982_v16  ;;  %2682 = vmatprep.subr.bf16.mxu0 %v2982_v16 }
 0x2eb   :  { %v1758_v38 = vpop.f32.mrf.mxu0  ;;  %2667 = vmatmul.mubr.msk.bf16.vlgmr.msra.gmra.mxu1 %vm1094_vm10, %v1312_v60  ;;  %2673 = vmatmul.mubr.msk.bf16.vlgmr.msra.gmra.mxu0 %vm1094_vm10, %v1313_v23 }
 0x2ec   :  { %v1714_v12 = vpop.f32.mrf.mxu1  ;;  %v1900_v43 = vpack.c.bf16 %v1758_v38, %v1758_v38  ;;  %2678 = vmatprep.mubr.msk.bf16.mxu1 %vm2983_vm1, %v2982_v16  ;;  %2684 = vmatprep.mubr.msk.bf16.mxu0 %vm2983_vm1, %v2982_v16 }
 0x2ed   :  { %v1899_v50 = vpack.c.bf16 %v1714_v12, %v1714_v12  ;;  %v2638_v52 = vpop.f32.mrf.mxu0 }
 0x2ee   :  { %v1942_v27 = vsel %vm176_vm0, %v1900_v43, %v1921_v13  ;;  %v2632_v15 = vpop.f32.mrf.mxu1 }
 0x2ef   :  { %v1939_v60 = vsel %vm176_vm0, %v1899_v50, %v1919_v31  ;;  %v2140_v20 = vsel %vm1955_vm7, %v1942_v27, 0  ;;  %v1761_v51 = vpop.f32.mrf.mxu0 }
 0x2f0   :  { %v2094_v23 = vsel %vm1955_vm7, %v1939_v60, 0  ;;  %v1717_v6 = vpop.f32.mrf.mxu1  ;;  %2683 = vmatpush3.bf16.msra.mxu0 %v2140_v20 }
 0x2f1   :  { %2677 = vmatpush3.bf16.msra.mxu1 %v2094_v23  ;;  %v2639_v63 = vpop.f32.mrf.mxu0  ;;  %2694 = vmatprep.subr.bf16.mxu0 %v2982_v16 }
 0x2f2   :  { %v2633_v10 = vpop.f32.mrf.mxu1  ;;  %2688 = vmatprep.subr.bf16.mxu1 %v2982_v16 }
 0x2f3   :  { %v1846_v47 = vpop.f32.mrf.mxu0  ;;  %2685 = vmatmul.mubr.msk.bf16.vlgmr.msra.gmra.mxu0 %vm1094_vm10, %v1315_v49 }
 0x2f4   :  { %v1902_v3 = vpack.c.bf16 %v1846_v47, %v1846_v47  ;;  %2679 = vmatmul.mubr.msk.bf16.vlgmr.msra.gmra.mxu1 %vm1094_vm10, %v1314_v36  ;;  %2696 = vmatprep.mubr.msk.bf16.mxu0 %vm2983_vm1, %v2982_v16 }
 0x2f5   :  { %v1802_v39 = vpop.f32.mrf.mxu1  ;;  %v2650_v29 = vpop.f32.mrf.mxu0  ;;  %2690 = vmatprep.mubr.msk.bf16.mxu1 %vm2983_vm1, %v2982_v16 }
 0x2f6   :  { %v1901_v18 = vpack.c.bf16 %v1802_v39, %v1802_v39  ;;  %v1948_v48 = vsel %vm176_vm0, %v1902_v3, %v1925_v57 }
 0x2f7   :  { %v2232_v32 = vsel %vm1955_vm7, %v1948_v48, 0  ;;  %v2644_v49 = vpop.f32.mrf.mxu1  ;;  %v1849_v7 = vpop.f32.mrf.mxu0 }
 0x2f8   :  { %v1945_v53 = vsel %vm176_vm0, %v1901_v18, %v1923_v59  ;;  %2695 = vmatpush3.bf16.msra.mxu0 %v2232_v32 }
 0x2f9   :  { %v2186_v44 = vsel %vm1955_vm7, %v1945_v53, 0  ;;  %v1805_v36 = vpop.f32.mrf.mxu1  ;;  %v2651_v42 = vpop.f32.mrf.mxu0 }
 0x2fa   :  { %2689 = vmatpush3.bf16.msra.mxu1 %v2186_v44 }
 0x2fb   :  { %v2645_v17 = vpop.f32.mrf.mxu1  ;;  %2697 = vmatmul.mubr.msk.bf16.vlgmr.msra.gmra.mxu0 %vm1094_vm10, %v1317_v41  ;;  %2700 = vmatprep.subr.bf16.mxu1 %v2982_v16 }
 0x2fd   :  { %v1890_v21 = vpop.f32.mrf.mxu1  ;;  %2691 = vmatmul.mubr.msk.bf16.vlgmr.msra.gmra.mxu1 %vm1094_vm10, %v1316_v1 }
 0x2fe   :  { %v1903_v22 = vpack.c.bf16 %v1890_v21, %v1890_v21  ;;  %2702 = vmatprep.mubr.msk.bf16.mxu1 %vm2983_vm1, %v2982_v16 }
 0x2ff   :  { %v2656_v37 = vpop.f32.mrf.mxu1 }
 0x300   :  { %v1951_v5 = vsel %vm176_vm0, %v1903_v22, %v1927_v54 }
 0x301   :  { %v2278_v56 = vsel %vm1955_vm7, %v1951_v5, 0  ;;  %v1893_v19 = vpop.f32.mrf.mxu1 }
 0x302   :  { %2701 = vmatpush3.bf16.msra.mxu1 %v2278_v56 }
 0x303   :  { %v2657_v41 = vpop.f32.mrf.mxu1 }
 0x305   :  { %2703 = vmatmul.mubr.msk.bf16.vlgmr.msra.gmra.mxu1 %vm1094_vm10, %v1318_v26 }
 0x3a3   :  { %v1992_v61 = vpop.f32.mrf.mxu0 }
 0x3a4   :  { %2322 = vst.msk [vmem:[#allocation11] sm:$0xff] %vm2321_vm11, %v1992_v61 }
 0x3a5   :  { %v2662_v62 = vpop.f32.mrf.mxu0 }
 0x3a7   :  { %v1995_v1 = vpop.f32.mrf.mxu0 }
 0x3a8   :  { %2323 = vst.msk [vmem:[#allocation11 + $0x8] sm:$0xff] %vm2321_vm11, %v1995_v1 }
 0x3a9   :  { %v2663_v16 = vpop.f32.mrf.mxu0 }
 0x3ab   :  { %v2038_v9 = vpop.f32.mrf.mxu1  ;;  %v2084_v58 = vpop.f32.mrf.mxu0 }
 0x3ac   :  { %2324 = vst.msk [vmem:[#allocation11 + $0x10] sm:$0xff] %vm2321_vm11, %v2038_v9  ;;  %2326 = vst.msk [vmem:[#allocation11 + $0x20] sm:$0xff] %vm2321_vm11, %v2084_v58 }
 0x3ad   :  { %v2668_v40 = vpop.f32.mrf.mxu1  ;;  %v2674_v30 = vpop.f32.mrf.mxu0 }
 0x3af   :  { %v2041_v2 = vpop.f32.mrf.mxu1  ;;  %v2087_v45 = vpop.f32.mrf.mxu0 }
 0x3b0   :  { %2325 = vst.msk [vmem:[#allocation11 + $0x18] sm:$0xff] %vm2321_vm11, %v2041_v2  ;;  %2327 = vst.msk [vmem:[#allocation11 + $0x28] sm:$0xff] %vm2321_vm11, %v2087_v45 }
 0x3b1   :  { %v2669_v26 = vpop.f32.mrf.mxu1  ;;  %v2675_v55 = vpop.f32.mrf.mxu0 }
 0x3b3   :  { %v2176_v33 = vpop.f32.mrf.mxu0 }
 0x3b4   :  { %v2130_v4 = vpop.f32.mrf.mxu1  ;;  %2330 = vst.msk [vmem:[#allocation11 + $0x40] sm:$0xff] %vm2321_vm11, %v2176_v33 }
 0x3b5   :  { %2328 = vst.msk [vmem:[#allocation11 + $0x30] sm:$0xff] %vm2321_vm11, %v2130_v4  ;;  %v2686_v24 = vpop.f32.mrf.mxu0 }
 0x3b6   :  { %v2680_v8 = vpop.f32.mrf.mxu1 }
 0x3b7   :  { %v2179_v34 = vpop.f32.mrf.mxu0 }
 0x3b8   :  { %v2133_v28 = vpop.f32.mrf.mxu1  ;;  %2331 = vst.msk [vmem:[#allocation11 + $0x48] sm:$0xff] %vm2321_vm11, %v2179_v34 }
 0x3b9   :  { %2329 = vst.msk [vmem:[#allocation11 + $0x38] sm:$0xff] %vm2321_vm11, %v2133_v28  ;;  %v2687_v11 = vpop.f32.mrf.mxu0 }
 0x3ba   :  { %v2681_v25 = vpop.f32.mrf.mxu1 }
 0x3bb   :  { %v2268_v46 = vpop.f32.mrf.mxu0 }
 0x3bc   :  { %2334 = vst.msk [vmem:[#allocation11 + $0x60] sm:$0xff] %vm2321_vm11, %v2268_v46 }
 0x3bd   :  { %v2222_v0 = vpop.f32.mrf.mxu1  ;;  %v2698_v35 = vpop.f32.mrf.mxu0 }
 0x3be   :  { %2332 = vst.msk [vmem:[#allocation11 + $0x50] sm:$0xff] %vm2321_vm11, %v2222_v0 }
 0x3bf   :  { %v2692_v14 = vpop.f32.mrf.mxu1  ;;  %v2271_v38 = vpop.f32.mrf.mxu0 }
 0x3c0   :  { %2335 = vst.msk [vmem:[#allocation11 + $0x68] sm:$0xff] %vm2321_vm11, %v2271_v38 }
 0x3c1   :  { %v2225_v13 = vpop.f32.mrf.mxu1  ;;  %v2699_v12 = vpop.f32.mrf.mxu0 }
 0x3c2   :  { %2333 = vst.msk [vmem:[#allocation11 + $0x58] sm:$0xff] %vm2321_vm11, %v2225_v13 }
 0x3c3   :  { %v2693_v43 = vpop.f32.mrf.mxu1 }
 0x3c5   :  { %v2314_v31 = vpop.f32.mrf.mxu1 }
 0x3c6   :  { %2336 = vst.msk [vmem:[#allocation11 + $0x70] sm:$0xff] %vm2321_vm11, %v2314_v31 }
 0x3c7   :  { %v2704_v50 = vpop.f32.mrf.mxu1 }
 0x3c9   :  { %v2317_v52 = vpop.f32.mrf.mxu1 }
 0x3ca   :  { %2337 = vst.msk [vmem:[#allocation11 + $0x78] sm:$0xff] %vm2321_vm11, %v2317_v52 }
 0x3cb   :  { %v2705_v27 = vpop.f32.mrf.mxu1 }
 0x3cc   :  { %2956 = shalt.err (!%p2953_p1)
}
 0x3cd   :  { %s2987_s26 = smov 128   ;;  %s2988_s27 = smov 8  }
 0x3ce   :  { %2349 = dma.vmem_to_hbm [thread:$0]  %s2344_s24, 2048, %s3782_s6, [#allocation4], %s2987_s26, %s2987_s26, %s2988_s27  }
 0x3cf   :  { %2971 = dma.done.wait [#allocation4], 2048  }
 0x3d0   :  { %2972 = vsyncadd [#allocation4], 4294965248 }
 0x3d1   :  { %2353 = vsyncpa [#allocation3], 1 }
 0x3d2   :  { %2354 = vsyncpa [#allocation6], 1 }
 0x3d3   :  { %2355 = vsyncpa [#allocation9], 1 }
 0x3d4   :  { %2356 = vsyncpa [#allocation4], 1 }

</bundles_post_ra>
